<compile_context>
chip_gen: v7x
topology: tpu7x:2x2x1
jax: 0.10.0
libtpu: 0.0.40
codegen_flags: <defaults>
</compile_context>

<pallas_src>
import functools

import jax
import jax.numpy as jnp
from jax.experimental import pallas as pl
from jax.experimental.pallas import tpu as pltpu


_PAD_MODE = {
    "zeros": "constant",
    "reflect": "reflect",
    "replicate": "edge",
    "circular": "wrap",
}


# ---------------------------------------------------------------------------
# Pallas kernel: fused im2col conv for one (batch, group) grid cell
# ---------------------------------------------------------------------------
def _conv_branch_kernel(x_ref, w_ref, b_ref, o_ref, *, kh, kw, wp, m,
                        compute_dtype):
    """Direct convolution as a sum of KH*KW shifted small GEMMs.

    x_ref: (cin, Lp)       flattened padded image (row-major: H major, W minor)
    w_ref: (kh*kw, cout, cin)  one small weight matrix per tap
    b_ref: (cout, 1)           bias (zeros when the branch has no bias)
    o_ref: (cout, m)           full-width output rows, m = Ho*Wp; the Wp-Wo
                               garbage columns per row are trimmed by the caller
    """
    acc = None
    for i in range(kh):
        for j in range(kw):
            t = i * kw + j
            start = i * wp + j                         # static tap offset
            x_tap = x_ref[:, start:start + m].astype(compute_dtype)  # (cin, m)
            w_tap = w_ref[t].astype(compute_dtype)                   # (cout, cin)
            d = jnp.dot(w_tap, x_tap, preferred_element_type=jnp.float32)
            acc = d if acc is None else acc + d
    o_ref[...] = (acc + b_ref[...]).astype(o_ref.dtype)


# ---------------------------------------------------------------------------
# One conv branch (all batches + all groups in a single pallas_call)
# ---------------------------------------------------------------------------
def conv2d_branch(x_sub, weight, bias, padding, groups, padding_mode,
                  compute_dtype):
    """x_sub: (N, Cin, H, W) f32; weight: (Cout, Cin//g, KH, KW).
    Returns the branch output directly in NCHW: (N, Cout, Ho, Wo)."""
    n, cin, h, w = x_sub.shape
    cout, cin_g, kh, kw = weight.shape
    g = int(groups)
    assert cin == cin_g * g and cout % g == 0
    cout_g = cout // g
    p = int(padding)

    # Spatial padding handles the PyTorch padding_mode semantics.  One extra
    # bottom row is added when kw > 1 so the "full-width" flattened tap slices
    # in the kernel never run past the buffer; it only feeds garbage columns.
    extra = 1 if kw > 1 else 0
    if p or extra:
        x_sub = jnp.pad(x_sub, ((0, 0), (0, 0), (p, p + extra), (p, p)),
                        mode=_PAD_MODE[padding_mode])
    hp, wp = h + 2 * p, w + 2 * p            # logical padded size
    ho, wo = hp - kh + 1, wp - kw + 1        # conv output size
    m = ho * wp                              # full-width rows per image plane
    lp = (hp + extra) * wp                   # flattened length actually stored

    # (N, g, cin_g, Hp*Wp): channels on sublanes, flattened space on lanes.
    # NOTE: each grid step holds one full (padded) plane per group in VMEM;
    # that is ~0.6 MiB for a 224x224x3 f32 plane, well within VMEM on all of
    # v5e / v6e / v7x.  (For very large spatial inputs, tile Ho as well.)
    x_flat = x_sub.reshape(n, g, cin_g, lp).astype(jnp.float32)

    # (g, kh*kw, cout_g, cin_g): one small (cout_g, cin_g) matrix per tap.
    w_taps = weight.reshape(g, cout_g, cin_g, kh, kw)
    w_taps = jnp.transpose(w_taps, (0, 3, 4, 1, 2)).reshape(
        g, kh * kw, cout_g, cin_g).astype(jnp.float32)

    b = bias if bias is not None else jnp.zeros((cout,), jnp.float32)
    b = b.astype(jnp.float32).reshape(g, cout_g, 1)

    kernel = functools.partial(_conv_branch_kernel, kh=kh, kw=kw, wp=wp, m=m,
                               compute_dtype=compute_dtype)

    out = pl.pallas_call(
        kernel,
        out_shape=jax.ShapeDtypeStruct((n, g, cout_g, m), jnp.float32),
        grid_spec=pltpu.PrefetchScalarGridSpec(
            num_scalar_prefetch=0,
            grid=(n, g),     # batch outermost so v7x's 2 TCs both get blocks
            in_specs=[
                pl.BlockSpec((None, None, cin_g, lp),
                             lambda i, j: (i, j, 0, 0)),
                pl.BlockSpec((None, kh * kw, cout_g, cin_g),
                             lambda i, j: (j, 0, 0, 0)),
                pl.BlockSpec((None, cout_g, 1),
                             lambda i, j: (j, 0, 0)),
            ],
            out_specs=pl.BlockSpec((None, None, cout_g, m),
                                   lambda i, j: (i, j, 0, 0)),
        ),
        compiler_params=pltpu.CompilerParams(
            dimension_semantics=("parallel", "parallel")),
    )(x_flat, w_taps, b)

    # Trim the Wp-Wo garbage columns and fold (g, cout_g) back into Cout.
    out = out.reshape(n, g, cout_g, ho, wp)[..., :wo]
    return out.reshape(n, cout, ho, wo)


# ---------------------------------------------------------------------------
# MultiKernelConv2D wrapper (parameter setup + per-branch dispatch is glue)
# ---------------------------------------------------------------------------
class MultiKernelConv2D:
    def __init__(self, in_channels_idx, out_channels_idx, kernel_sizes,
                 paddings, bias, padding_modes, groups=None, *, key,
                 compute_dtype=jnp.float32):
        if not groups:
            groups = [1] * len(in_channels_idx)
        assert (len(in_channels_idx) == len(out_channels_idx)
                == len(kernel_sizes) == len(paddings) == len(bias)
                == len(padding_modes) == len(groups))
        self.in_channels_idx = [list(map(int, ic)) for ic in in_channels_idx]
        self.paddings = paddings
        self.groups = groups
        self.padding_modes = padding_modes
        self.compute_dtype = compute_dtype

        self.weights = []
        self.biases = []
        for in_ch, out_ch, k, gg, b in zip(in_channels_idx, out_channels_idx,
                                           kernel_sizes, groups, bias):
            cin = len(in_ch)
            key, wk, bk = jax.random.split(key, 3)
            fan_in = (cin // gg) * k * k
            bound = 1.0 / float(fan_in) ** 0.5
            w_arr = jax.random.uniform(wk, (out_ch, cin // gg, k, k),
                                       minval=-bound, maxval=bound,
                                       dtype=jnp.float32)
            self.weights.append(w_arr)
            if b:
                b_arr = jax.random.uniform(bk, (out_ch,), minval=-bound,
                                           maxval=bound, dtype=jnp.float32)
            else:
                b_arr = None
            self.biases.append(b_arr)

    def __call__(self, x, compute_dtype=None):
        cd = self.compute_dtype if compute_dtype is None else compute_dtype
        outs = []
        # NOTE: branches keep separate pallas_calls because they have
        # different kernel sizes / padding modes; groups + batch are fused
        # into each call's grid.
        for c in range(len(self.weights)):
            idx = jnp.asarray(self.in_channels_idx[c], dtype=jnp.int32)
            x_sub = jnp.take(x, idx, axis=1)
            outs.append(conv2d_branch(x_sub, self.weights[c], self.biases[c],
                                      self.paddings[c], self.groups[c],
                                      self.padding_modes[c], cd))
        # Branch outputs are already NCHW -> single channel concat, no
        # per-branch layout transposes.
        return jnp.concatenate(outs, axis=1)


# ---------------------------------------------------------------------------
# Pure-JAX reference (correctness check only)
# ---------------------------------------------------------------------------
def reference_forward(module, x, operand_dtype=jnp.float32):
    """lax.conv reference.  operand_dtype=bfloat16 reproduces the kernel's
    bf16-operand / f32-accumulate MXU path by pre-rounding the operands."""
    def rnd(a):
        return a.astype(operand_dtype).astype(jnp.float32)

    outs = []
    for c in range(len(module.weights)):
        idx = jnp.asarray(module.in_channels_idx[c], dtype=jnp.int32)
        xs = rnd(jnp.take(x, idx, axis=1))
        p = int(module.paddings[c])
        if p:
            xs = jnp.pad(xs, ((0, 0), (0, 0), (p, p), (p, p)),
                         mode=_PAD_MODE[module.padding_modes[c]])
        o = jax.lax.conv_general_dilated(
            xs, rnd(module.weights[c]), window_strides=(1, 1),
            padding="VALID",
            dimension_numbers=("NCHW", "OIHW", "NCHW"),
            feature_group_count=module.groups[c])
        if module.biases[c] is not None:
            o = o + module.biases[c][None, :, None, None]
        outs.append(o)
    return jnp.concatenate(outs, axis=1)


if __name__ == "__main__":
    key = jax.random.PRNGKey(0)
    k_x, k_params = jax.random.split(key)

    # Small synthetic config: 3 conv branches over a 4-channel NCHW input.
    module = MultiKernelConv2D(
        in_channels_idx=[[0, 1], [1, 2, 3], [0, 3]],
        out_channels_idx=[3, 5, 4],
        kernel_sizes=[3, 5, 1],
        paddings=[1, 2, 0],
        bias=[True, False, True],
        padding_modes=["zeros", "replicate", "zeros"],
        groups=None,
        key=k_params,
    )

    x = jax.random.normal(k_x, (2, 4, 16, 16), dtype=jnp.float32)  # NCHW

    # --- f32-operand path: matches the PyTorch module's numerics -----------
    fwd_f32 = jax.jit(lambda xx: module(xx, compute_dtype=jnp.float32))
    out = jax.block_until_ready(fwd_f32(x))
    assert out.shape == (2, 3 + 5 + 4, 16, 16), out.shape
    ref = jax.block_until_ready(reference_forward(module, x))
    err = float(jnp.max(jnp.abs(out - ref)))
    assert jnp.allclose(out, ref, atol=1e-4, rtol=1e-4), err

    # --- bf16-operand MXU path (f32 accumulation) ---------------------------
    fwd_bf16 = jax.jit(lambda xx: module(xx, compute_dtype=jnp.bfloat16))
    out_bf16 = jax.block_until_ready(fwd_bf16(x))
    ref_bf16 = jax.block_until_ready(
        reference_forward(module, x, operand_dtype=jnp.bfloat16))
    err_bf16 = float(jnp.max(jnp.abs(out_bf16 - ref_bf16)))
    assert jnp.allclose(out_bf16, ref_bf16, atol=2e-3, rtol=2e-3), err_bf16

    print("KERNEL_OK")
</pallas_src>

<mosaic_0001>
module attributes {stable_mosaic.version = 11 : i64} {
  func.func @_conv_branch_kernel(%arg0: i32, %arg1: i32, %arg2: memref<1x1x2x342xf32, #tpu.memory_space<vmem>>, %arg3: memref<1x9x3x2xf32, #tpu.memory_space<vmem>>, %arg4: memref<1x3x1xf32, #tpu.memory_space<vmem>>, %arg5: memref<1x1x3x288xf32, #tpu.memory_space<vmem>>) attributes {dimension_semantics = [#tpu.dimension_semantics<parallel>, #tpu.dimension_semantics<parallel>], iteration_bounds = array<i64: 2, 1>, scalar_prefetch = 0 : i64, scratch_operands = 0 : i64, tpu.core_type = #tpu.core_type<tc>, window_params = [{transform_indices = @transform_0, window_bounds = array<i64: 1, 1, 2, 342>}, {transform_indices = @transform_1, window_bounds = array<i64: 1, 9, 3, 2>}, {transform_indices = @transform_2, window_bounds = array<i64: 1, 3, 1>}, {transform_indices = @transform_3, window_bounds = array<i64: 1, 1, 3, 288>}]} {
    %c0 = arith.constant 0 : index
    %c0_0 = arith.constant 0 : index
    %c0_1 = arith.constant 0 : index
    %c0_2 = arith.constant 0 : index
    %0 = vector.load %arg2[%c0, %c0_0, %c0_1, %c0_2] : memref<1x1x2x342xf32, #tpu.memory_space<vmem>>, vector<1x1x2x288xf32>
    %1 = vector.shape_cast %0 : vector<1x1x2x288xf32> to vector<2x288xf32>
    %c0_3 = arith.constant 0 : index
    %c0_4 = arith.constant 0 : index
    %c0_5 = arith.constant 0 : index
    %c0_6 = arith.constant 0 : index
    %2 = vector.load %arg3[%c0_3, %c0_4, %c0_5, %c0_6] : memref<1x9x3x2xf32, #tpu.memory_space<vmem>>, vector<1x1x3x2xf32>
    %3 = vector.shape_cast %2 : vector<1x1x3x2xf32> to vector<3x2xf32>
    %cst = arith.constant dense<0.000000e+00> : vector<3x288xf32>
    %4 = tpu.matmul %3, %1, %cst {dimension_numbers = #tpu.dot_dimension_numbers<[1], [0], [0], [1], [0, 0, 1, 1], [], []>} : vector<3x2xf32>, vector<2x288xf32>, vector<3x288xf32> -> vector<3x288xf32>
    %c0_7 = arith.constant 0 : index
    %c0_8 = arith.constant 0 : index
    %c0_9 = arith.constant 0 : index
    %c1 = arith.constant 1 : index
    %5 = vector.load %arg2[%c0_7, %c0_8, %c0_9, %c1] : memref<1x1x2x342xf32, #tpu.memory_space<vmem>>, vector<1x1x2x288xf32>
    %6 = vector.shape_cast %5 : vector<1x1x2x288xf32> to vector<2x288xf32>
    %c0_10 = arith.constant 0 : index
    %c1_11 = arith.constant 1 : index
    %c0_12 = arith.constant 0 : index
    %c0_13 = arith.constant 0 : index
    %7 = vector.load %arg3[%c0_10, %c1_11, %c0_12, %c0_13] : memref<1x9x3x2xf32, #tpu.memory_space<vmem>>, vector<1x1x3x2xf32>
    %8 = vector.shape_cast %7 : vector<1x1x3x2xf32> to vector<3x2xf32>
    %cst_14 = arith.constant dense<0.000000e+00> : vector<3x288xf32>
    %9 = tpu.matmul %8, %6, %cst_14 {dimension_numbers = #tpu.dot_dimension_numbers<[1], [0], [0], [1], [0, 0, 1, 1], [], []>} : vector<3x2xf32>, vector<2x288xf32>, vector<3x288xf32> -> vector<3x288xf32>
    %10 = arith.addf %4, %9 : vector<3x288xf32>
    %c0_15 = arith.constant 0 : index
    %c0_16 = arith.constant 0 : index
    %c0_17 = arith.constant 0 : index
    %c2 = arith.constant 2 : index
    %11 = vector.load %arg2[%c0_15, %c0_16, %c0_17, %c2] : memref<1x1x2x342xf32, #tpu.memory_space<vmem>>, vector<1x1x2x288xf32>
    %12 = vector.shape_cast %11 : vector<1x1x2x288xf32> to vector<2x288xf32>
    %c0_18 = arith.constant 0 : index
    %c2_19 = arith.constant 2 : index
    %c0_20 = arith.constant 0 : index
    %c0_21 = arith.constant 0 : index
    %13 = vector.load %arg3[%c0_18, %c2_19, %c0_20, %c0_21] : memref<1x9x3x2xf32, #tpu.memory_space<vmem>>, vector<1x1x3x2xf32>
    %14 = vector.shape_cast %13 : vector<1x1x3x2xf32> to vector<3x2xf32>
    %cst_22 = arith.constant dense<0.000000e+00> : vector<3x288xf32>
    %15 = tpu.matmul %14, %12, %cst_22 {dimension_numbers = #tpu.dot_dimension_numbers<[1], [0], [0], [1], [0, 0, 1, 1], [], []>} : vector<3x2xf32>, vector<2x288xf32>, vector<3x288xf32> -> vector<3x288xf32>
    %16 = arith.addf %10, %15 : vector<3x288xf32>
    %c0_23 = arith.constant 0 : index
    %c0_24 = arith.constant 0 : index
    %c0_25 = arith.constant 0 : index
    %c18 = arith.constant 18 : index
    %17 = vector.load %arg2[%c0_23, %c0_24, %c0_25, %c18] : memref<1x1x2x342xf32, #tpu.memory_space<vmem>>, vector<1x1x2x288xf32>
    %18 = vector.shape_cast %17 : vector<1x1x2x288xf32> to vector<2x288xf32>
    %c0_26 = arith.constant 0 : index
    %c3 = arith.constant 3 : index
    %c0_27 = arith.constant 0 : index
    %c0_28 = arith.constant 0 : index
    %19 = vector.load %arg3[%c0_26, %c3, %c0_27, %c0_28] : memref<1x9x3x2xf32, #tpu.memory_space<vmem>>, vector<1x1x3x2xf32>
    %20 = vector.shape_cast %19 : vector<1x1x3x2xf32> to vector<3x2xf32>
    %cst_29 = arith.constant dense<0.000000e+00> : vector<3x288xf32>
    %21 = tpu.matmul %20, %18, %cst_29 {dimension_numbers = #tpu.dot_dimension_numbers<[1], [0], [0], [1], [0, 0, 1, 1], [], []>} : vector<3x2xf32>, vector<2x288xf32>, vector<3x288xf32> -> vector<3x288xf32>
    %22 = arith.addf %16, %21 : vector<3x288xf32>
    %c0_30 = arith.constant 0 : index
    %c0_31 = arith.constant 0 : index
    %c0_32 = arith.constant 0 : index
    %c19 = arith.constant 19 : index
    %23 = vector.load %arg2[%c0_30, %c0_31, %c0_32, %c19] : memref<1x1x2x342xf32, #tpu.memory_space<vmem>>, vector<1x1x2x288xf32>
    %24 = vector.shape_cast %23 : vector<1x1x2x288xf32> to vector<2x288xf32>
    %c0_33 = arith.constant 0 : index
    %c4 = arith.constant 4 : index
    %c0_34 = arith.constant 0 : index
    %c0_35 = arith.constant 0 : index
    %25 = vector.load %arg3[%c0_33, %c4, %c0_34, %c0_35] : memref<1x9x3x2xf32, #tpu.memory_space<vmem>>, vector<1x1x3x2xf32>
    %26 = vector.shape_cast %25 : vector<1x1x3x2xf32> to vector<3x2xf32>
    %cst_36 = arith.constant dense<0.000000e+00> : vector<3x288xf32>
    %27 = tpu.matmul %26, %24, %cst_36 {dimension_numbers = #tpu.dot_dimension_numbers<[1], [0], [0], [1], [0, 0, 1, 1], [], []>} : vector<3x2xf32>, vector<2x288xf32>, vector<3x288xf32> -> vector<3x288xf32>
    %28 = arith.addf %22, %27 : vector<3x288xf32>
    %c0_37 = arith.constant 0 : index
    %c0_38 = arith.constant 0 : index
    %c0_39 = arith.constant 0 : index
    %c20 = arith.constant 20 : index
    %29 = vector.load %arg2[%c0_37, %c0_38, %c0_39, %c20] : memref<1x1x2x342xf32, #tpu.memory_space<vmem>>, vector<1x1x2x288xf32>
    %30 = vector.shape_cast %29 : vector<1x1x2x288xf32> to vector<2x288xf32>
    %c0_40 = arith.constant 0 : index
    %c5 = arith.constant 5 : index
    %c0_41 = arith.constant 0 : index
    %c0_42 = arith.constant 0 : index
    %31 = vector.load %arg3[%c0_40, %c5, %c0_41, %c0_42] : memref<1x9x3x2xf32, #tpu.memory_space<vmem>>, vector<1x1x3x2xf32>
    %32 = vector.shape_cast %31 : vector<1x1x3x2xf32> to vector<3x2xf32>
    %cst_43 = arith.constant dense<0.000000e+00> : vector<3x288xf32>
    %33 = tpu.matmul %32, %30, %cst_43 {dimension_numbers = #tpu.dot_dimension_numbers<[1], [0], [0], [1], [0, 0, 1, 1], [], []>} : vector<3x2xf32>, vector<2x288xf32>, vector<3x288xf32> -> vector<3x288xf32>
    %34 = arith.addf %28, %33 : vector<3x288xf32>
    %c0_44 = arith.constant 0 : index
    %c0_45 = arith.constant 0 : index
    %c0_46 = arith.constant 0 : index
    %c36 = arith.constant 36 : index
    %35 = vector.load %arg2[%c0_44, %c0_45, %c0_46, %c36] : memref<1x1x2x342xf32, #tpu.memory_space<vmem>>, vector<1x1x2x288xf32>
    %36 = vector.shape_cast %35 : vector<1x1x2x288xf32> to vector<2x288xf32>
    %c0_47 = arith.constant 0 : index
    %c6 = arith.constant 6 : index
    %c0_48 = arith.constant 0 : index
    %c0_49 = arith.constant 0 : index
    %37 = vector.load %arg3[%c0_47, %c6, %c0_48, %c0_49] : memref<1x9x3x2xf32, #tpu.memory_space<vmem>>, vector<1x1x3x2xf32>
    %38 = vector.shape_cast %37 : vector<1x1x3x2xf32> to vector<3x2xf32>
    %cst_50 = arith.constant dense<0.000000e+00> : vector<3x288xf32>
    %39 = tpu.matmul %38, %36, %cst_50 {dimension_numbers = #tpu.dot_dimension_numbers<[1], [0], [0], [1], [0, 0, 1, 1], [], []>} : vector<3x2xf32>, vector<2x288xf32>, vector<3x288xf32> -> vector<3x288xf32>
    %40 = arith.addf %34, %39 : vector<3x288xf32>
    %c0_51 = arith.constant 0 : index
    %c0_52 = arith.constant 0 : index
    %c0_53 = arith.constant 0 : index
    %c37 = arith.constant 37 : index
    %41 = vector.load %arg2[%c0_51, %c0_52, %c0_53, %c37] : memref<1x1x2x342xf32, #tpu.memory_space<vmem>>, vector<1x1x2x288xf32>
    %42 = vector.shape_cast %41 : vector<1x1x2x288xf32> to vector<2x288xf32>
    %c0_54 = arith.constant 0 : index
    %c7 = arith.constant 7 : index
    %c0_55 = arith.constant 0 : index
    %c0_56 = arith.constant 0 : index
    %43 = vector.load %arg3[%c0_54, %c7, %c0_55, %c0_56] : memref<1x9x3x2xf32, #tpu.memory_space<vmem>>, vector<1x1x3x2xf32>
    %44 = vector.shape_cast %43 : vector<1x1x3x2xf32> to vector<3x2xf32>
    %cst_57 = arith.constant dense<0.000000e+00> : vector<3x288xf32>
    %45 = tpu.matmul %44, %42, %cst_57 {dimension_numbers = #tpu.dot_dimension_numbers<[1], [0], [0], [1], [0, 0, 1, 1], [], []>} : vector<3x2xf32>, vector<2x288xf32>, vector<3x288xf32> -> vector<3x288xf32>
    %46 = arith.addf %40, %45 : vector<3x288xf32>
    %c0_58 = arith.constant 0 : index
    %c0_59 = arith.constant 0 : index
    %c0_60 = arith.constant 0 : index
    %c38 = arith.constant 38 : index
    %47 = vector.load %arg2[%c0_58, %c0_59, %c0_60, %c38] : memref<1x1x2x342xf32, #tpu.memory_space<vmem>>, vector<1x1x2x288xf32>
    %48 = vector.shape_cast %47 : vector<1x1x2x288xf32> to vector<2x288xf32>
    %c0_61 = arith.constant 0 : index
    %c8 = arith.constant 8 : index
    %c0_62 = arith.constant 0 : index
    %c0_63 = arith.constant 0 : index
    %49 = vector.load %arg3[%c0_61, %c8, %c0_62, %c0_63] : memref<1x9x3x2xf32, #tpu.memory_space<vmem>>, vector<1x1x3x2xf32>
    %50 = vector.shape_cast %49 : vector<1x1x3x2xf32> to vector<3x2xf32>
    %cst_64 = arith.constant dense<0.000000e+00> : vector<3x288xf32>
    %51 = tpu.matmul %50, %48, %cst_64 {dimension_numbers = #tpu.dot_dimension_numbers<[1], [0], [0], [1], [0, 0, 1, 1], [], []>} : vector<3x2xf32>, vector<2x288xf32>, vector<3x288xf32> -> vector<3x288xf32>
    %52 = arith.addf %46, %51 : vector<3x288xf32>
    %c0_65 = arith.constant 0 : index
    %c0_66 = arith.constant 0 : index
    %c0_67 = arith.constant 0 : index
    %53 = vector.load %arg4[%c0_65, %c0_66, %c0_67] : memref<1x3x1xf32, #tpu.memory_space<vmem>>, vector<1x3x1xf32>
    %54 = vector.shape_cast %53 : vector<1x3x1xf32> to vector<3x1xf32>
    %55 = vector.broadcast %54 : vector<3x1xf32> to vector<3x288xf32>
    %56 = arith.addf %52, %55 : vector<3x288xf32>
    %c0_68 = arith.constant 0 : index
    %c0_69 = arith.constant 0 : index
    %c0_70 = arith.constant 0 : index
    %c0_71 = arith.constant 0 : index
    %57 = vector.load %arg5[%c0_68, %c0_69, %c0_70, %c0_71] : memref<1x1x3x288xf32, #tpu.memory_space<vmem>>, vector<1x1x3x288xf32>
    %58 = vector.shape_cast %57 : vector<1x1x3x288xf32> to vector<3x288xf32>
    %59 = vector.shape_cast %56 : vector<3x288xf32> to vector<1x1x3x288xf32>
    tpu.vector_store %arg5[%c0_68, %c0_69, %c0_70, %c0_71], %59 {strides = array<i32>} : memref<1x1x3x288xf32, #tpu.memory_space<vmem>>, vector<1x1x3x288xf32>,
    return
  }
  func.func @transform_0(%arg0: i32, %arg1: i32) -> (i32, i32, i32, i32) {
    %c0_i32 = arith.constant 0 : i32
    %c0_i32_0 = arith.constant 0 : i32
    %c0_i32_1 = arith.constant 0 : i32
    return %arg0, %arg1, %c0_i32, %c0_i32_0 : i32, i32, i32, i32
  }
  func.func @transform_1(%arg0: i32, %arg1: i32) -> (i32, i32, i32, i32) {
    %c0_i32 = arith.constant 0 : i32
    %c0_i32_0 = arith.constant 0 : i32
    %c0_i32_1 = arith.constant 0 : i32
    %c0_i32_2 = arith.constant 0 : i32
    return %arg1, %c0_i32, %c0_i32_0, %c0_i32_1 : i32, i32, i32, i32
  }
  func.func @transform_2(%arg0: i32, %arg1: i32) -> (i32, i32, i32) {
    %c0_i32 = arith.constant 0 : i32
    %c0_i32_0 = arith.constant 0 : i32
    %c0_i32_1 = arith.constant 0 : i32
    return %arg1, %c0_i32, %c0_i32_0 : i32, i32, i32
  }
  func.func @transform_3(%arg0: i32, %arg1: i32) -> (i32, i32, i32, i32) {
    %c0_i32 = arith.constant 0 : i32
    %c0_i32_0 = arith.constant 0 : i32
    %c0_i32_1 = arith.constant 0 : i32
    return %arg0, %arg1, %c0_i32, %c0_i32_0 : i32, i32, i32, i32
  }
}

module attributes {stable_mosaic.version = 11 : i64} {
  func.func @_conv_branch_kernel(%arg0: i32, %arg1: i32, %arg2: memref<1x1x3x420xf32, #tpu.memory_space<vmem>>, %arg3: memref<1x25x5x3xf32, #tpu.memory_space<vmem>>, %arg4: memref<1x5x1xf32, #tpu.memory_space<vmem>>, %arg5: memref<1x1x5x320xf32, #tpu.memory_space<vmem>>) attributes {dimension_semantics = [#tpu.dimension_semantics<parallel>, #tpu.dimension_semantics<parallel>], iteration_bounds = array<i64: 2, 1>, scalar_prefetch = 0 : i64, scratch_operands = 0 : i64, tpu.core_type = #tpu.core_type<tc>, window_params = [{transform_indices = @transform_0, window_bounds = array<i64: 1, 1, 3, 420>}, {transform_indices = @transform_1, window_bounds = array<i64: 1, 25, 5, 3>}, {transform_indices = @transform_2, window_bounds = array<i64: 1, 5, 1>}, {transform_indices = @transform_3, window_bounds = array<i64: 1, 1, 5, 320>}]} {
    %c0 = arith.constant 0 : index
    %c0_0 = arith.constant 0 : index
    %c0_1 = arith.constant 0 : index
    %c0_2 = arith.constant 0 : index
    %0 = vector.load %arg2[%c0, %c0_0, %c0_1, %c0_2] : memref<1x1x3x420xf32, #tpu.memory_space<vmem>>, vector<1x1x3x320xf32>
    %1 = vector.shape_cast %0 : vector<1x1x3x320xf32> to vector<3x320xf32>
    %c0_3 = arith.constant 0 : index
    %c0_4 = arith.constant 0 : index
    %c0_5 = arith.constant 0 : index
    %c0_6 = arith.constant 0 : index
    %2 = vector.load %arg3[%c0_3, %c0_4, %c0_5, %c0_6] : memref<1x25x5x3xf32, #tpu.memory_space<vmem>>, vector<1x1x5x3xf32>
    %3 = vector.shape_cast %2 : vector<1x1x5x3xf32> to vector<5x3xf32>
    %cst = arith.constant dense<0.000000e+00> : vector<5x320xf32>
    %4 = tpu.matmul %3, %1, %cst {dimension_numbers = #tpu.dot_dimension_numbers<[1], [0], [0], [1], [0, 0, 1, 1], [], []>} : vector<5x3xf32>, vector<3x320xf32>, vector<5x320xf32> -> vector<5x320xf32>
    %c0_7 = arith.constant 0 : index
    %c0_8 = arith.constant 0 : index
    %c0_9 = arith.constant 0 : index
    %c1 = arith.constant 1 : index
    %5 = vector.load %arg2[%c0_7, %c0_8, %c0_9, %c1] : memref<1x1x3x420xf32, #tpu.memory_space<vmem>>, vector<1x1x3x320xf32>
    %6 = vector.shape_cast %5 : vector<1x1x3x320xf32> to vector<3x320xf32>
    %c0_10 = arith.constant 0 : index
    %c1_11 = arith.constant 1 : index
    %c0_12 = arith.constant 0 : index
    %c0_13 = arith.constant 0 : index
    %7 = vector.load %arg3[%c0_10, %c1_11, %c0_12, %c0_13] : memref<1x25x5x3xf32, #tpu.memory_space<vmem>>, vector<1x1x5x3xf32>
    %8 = vector.shape_cast %7 : vector<1x1x5x3xf32> to vector<5x3xf32>
    %cst_14 = arith.constant dense<0.000000e+00> : vector<5x320xf32>
    %9 = tpu.matmul %8, %6, %cst_14 {dimension_numbers = #tpu.dot_dimension_numbers<[1], [0], [0], [1], [0, 0, 1, 1], [], []>} : vector<5x3xf32>, vector<3x320xf32>, vector<5x320xf32> -> vector<5x320xf32>
    %10 = arith.addf %4, %9 : vector<5x320xf32>
    %c0_15 = arith.constant 0 : index
    %c0_16 = arith.constant 0 : index
    %c0_17 = arith.constant 0 : index
    %c2 = arith.constant 2 : index
    %11 = vector.load %arg2[%c0_15, %c0_16, %c0_17, %c2] : memref<1x1x3x420xf32, #tpu.memory_space<vmem>>, vector<1x1x3x320xf32>
    %12 = vector.shape_cast %11 : vector<1x1x3x320xf32> to vector<3x320xf32>
    %c0_18 = arith.constant 0 : index
    %c2_19 = arith.constant 2 : index
    %c0_20 = arith.constant 0 : index
    %c0_21 = arith.constant 0 : index
    %13 = vector.load %arg3[%c0_18, %c2_19, %c0_20, %c0_21] : memref<1x25x5x3xf32, #tpu.memory_space<vmem>>, vector<1x1x5x3xf32>
    %14 = vector.shape_cast %13 : vector<1x1x5x3xf32> to vector<5x3xf32>
    %cst_22 = arith.constant dense<0.000000e+00> : vector<5x320xf32>
    %15 = tpu.matmul %14, %12, %cst_22 {dimension_numbers = #tpu.dot_dimension_numbers<[1], [0], [0], [1], [0, 0, 1, 1], [], []>} : vector<5x3xf32>, vector<3x320xf32>, vector<5x320xf32> -> vector<5x320xf32>
    %16 = arith.addf %10, %15 : vector<5x320xf32>
    %c0_23 = arith.constant 0 : index
    %c0_24 = arith.constant 0 : index
    %c0_25 = arith.constant 0 : index
    %c3 = arith.constant 3 : index
    %17 = vector.load %arg2[%c0_23, %c0_24, %c0_25, %c3] : memref<1x1x3x420xf32, #tpu.memory_space<vmem>>, vector<1x1x3x320xf32>
    %18 = vector.shape_cast %17 : vector<1x1x3x320xf32> to vector<3x320xf32>
    %c0_26 = arith.constant 0 : index
    %c3_27 = arith.constant 3 : index
    %c0_28 = arith.constant 0 : index
    %c0_29 = arith.constant 0 : index
    %19 = vector.load %arg3[%c0_26, %c3_27, %c0_28, %c0_29] : memref<1x25x5x3xf32, #tpu.memory_space<vmem>>, vector<1x1x5x3xf32>
    %20 = vector.shape_cast %19 : vector<1x1x5x3xf32> to vector<5x3xf32>
    %cst_30 = arith.constant dense<0.000000e+00> : vector<5x320xf32>
    %21 = tpu.matmul %20, %18, %cst_30 {dimension_numbers = #tpu.dot_dimension_numbers<[1], [0], [0], [1], [0, 0, 1, 1], [], []>} : vector<5x3xf32>, vector<3x320xf32>, vector<5x320xf32> -> vector<5x320xf32>
    %22 = arith.addf %16, %21 : vector<5x320xf32>
    %c0_31 = arith.constant 0 : index
    %c0_32 = arith.constant 0 : index
    %c0_33 = arith.constant 0 : index
    %c4 = arith.constant 4 : index
    %23 = vector.load %arg2[%c0_31, %c0_32, %c0_33, %c4] : memref<1x1x3x420xf32, #tpu.memory_space<vmem>>, vector<1x1x3x320xf32>
    %24 = vector.shape_cast %23 : vector<1x1x3x320xf32> to vector<3x320xf32>
    %c0_34 = arith.constant 0 : index
    %c4_35 = arith.constant 4 : index
    %c0_36 = arith.constant 0 : index
    %c0_37 = arith.constant 0 : index
    %25 = vector.load %arg3[%c0_34, %c4_35, %c0_36, %c0_37] : memref<1x25x5x3xf32, #tpu.memory_space<vmem>>, vector<1x1x5x3xf32>
    %26 = vector.shape_cast %25 : vector<1x1x5x3xf32> to vector<5x3xf32>
    %cst_38 = arith.constant dense<0.000000e+00> : vector<5x320xf32>
    %27 = tpu.matmul %26, %24, %cst_38 {dimension_numbers = #tpu.dot_dimension_numbers<[1], [0], [0], [1], [0, 0, 1, 1], [], []>} : vector<5x3xf32>, vector<3x320xf32>, vector<5x320xf32> -> vector<5x320xf32>
    %28 = arith.addf %22, %27 : vector<5x320xf32>
    %c0_39 = arith.constant 0 : index
    %c0_40 = arith.constant 0 : index
    %c0_41 = arith.constant 0 : index
    %c20 = arith.constant 20 : index
    %29 = vector.load %arg2[%c0_39, %c0_40, %c0_41, %c20] : memref<1x1x3x420xf32, #tpu.memory_space<vmem>>, vector<1x1x3x320xf32>
    %30 = vector.shape_cast %29 : vector<1x1x3x320xf32> to vector<3x320xf32>
    %c0_42 = arith.constant 0 : index
    %c5 = arith.constant 5 : index
    %c0_43 = arith.constant 0 : index
    %c0_44 = arith.constant 0 : index
    %31 = vector.load %arg3[%c0_42, %c5, %c0_43, %c0_44] : memref<1x25x5x3xf32, #tpu.memory_space<vmem>>, vector<1x1x5x3xf32>
    %32 = vector.shape_cast %31 : vector<1x1x5x3xf32> to vector<5x3xf32>
    %cst_45 = arith.constant dense<0.000000e+00> : vector<5x320xf32>
    %33 = tpu.matmul %32, %30, %cst_45 {dimension_numbers = #tpu.dot_dimension_numbers<[1], [0], [0], [1], [0, 0, 1, 1], [], []>} : vector<5x3xf32>, vector<3x320xf32>, vector<5x320xf32> -> vector<5x320xf32>
    %34 = arith.addf %28, %33 : vector<5x320xf32>
    %c0_46 = arith.constant 0 : index
    %c0_47 = arith.constant 0 : index
    %c0_48 = arith.constant 0 : index
    %c21 = arith.constant 21 : index
    %35 = vector.load %arg2[%c0_46, %c0_47, %c0_48, %c21] : memref<1x1x3x420xf32, #tpu.memory_space<vmem>>, vector<1x1x3x320xf32>
    %36 = vector.shape_cast %35 : vector<1x1x3x320xf32> to vector<3x320xf32>
    %c0_49 = arith.constant 0 : index
    %c6 = arith.constant 6 : index
    %c0_50 = arith.constant 0 : index
    %c0_51 = arith.constant 0 : index
    %37 = vector.load %arg3[%c0_49, %c6, %c0_50, %c0_51] : memref<1x25x5x3xf32, #tpu.memory_space<vmem>>, vector<1x1x5x3xf32>
    %38 = vector.shape_cast %37 : vector<1x1x5x3xf32> to vector<5x3xf32>
    %cst_52 = arith.constant dense<0.000000e+00> : vector<5x320xf32>
    %39 = tpu.matmul %38, %36, %cst_52 {dimension_numbers = #tpu.dot_dimension_numbers<[1], [0], [0], [1], [0, 0, 1, 1], [], []>} : vector<5x3xf32>, vector<3x320xf32>, vector<5x320xf32> -> vector<5x320xf32>
    %40 = arith.addf %34, %39 : vector<5x320xf32>
    %c0_53 = arith.constant 0 : index
    %c0_54 = arith.constant 0 : index
    %c0_55 = arith.constant 0 : index
    %c22 = arith.constant 22 : index
    %41 = vector.load %arg2[%c0_53, %c0_54, %c0_55, %c22] : memref<1x1x3x420xf32, #tpu.memory_space<vmem>>, vector<1x1x3x320xf32>
    %42 = vector.shape_cast %41 : vector<1x1x3x320xf32> to vector<3x320xf32>
    %c0_56 = arith.constant 0 : index
    %c7 = arith.constant 7 : index
    %c0_57 = arith.constant 0 : index
    %c0_58 = arith.constant 0 : index
    %43 = vector.load %arg3[%c0_56, %c7, %c0_57, %c0_58] : memref<1x25x5x3xf32, #tpu.memory_space<vmem>>, vector<1x1x5x3xf32>
    %44 = vector.shape_cast %43 : vector<1x1x5x3xf32> to vector<5x3xf32>
    %cst_59 = arith.constant dense<0.000000e+00> : vector<5x320xf32>
    %45 = tpu.matmul %44, %42, %cst_59 {dimension_numbers = #tpu.dot_dimension_numbers<[1], [0], [0], [1], [0, 0, 1, 1], [], []>} : vector<5x3xf32>, vector<3x320xf32>, vector<5x320xf32> -> vector<5x320xf32>
    %46 = arith.addf %40, %45 : vector<5x320xf32>
    %c0_60 = arith.constant 0 : index
    %c0_61 = arith.constant 0 : index
    %c0_62 = arith.constant 0 : index
    %c23 = arith.constant 23 : index
    %47 = vector.load %arg2[%c0_60, %c0_61, %c0_62, %c23] : memref<1x1x3x420xf32, #tpu.memory_space<vmem>>, vector<1x1x3x320xf32>
    %48 = vector.shape_cast %47 : vector<1x1x3x320xf32> to vector<3x320xf32>
    %c0_63 = arith.constant 0 : index
    %c8 = arith.constant 8 : index
    %c0_64 = arith.constant 0 : index
    %c0_65 = arith.constant 0 : index
    %49 = vector.load %arg3[%c0_63, %c8, %c0_64, %c0_65] : memref<1x25x5x3xf32, #tpu.memory_space<vmem>>, vector<1x1x5x3xf32>
    %50 = vector.shape_cast %49 : vector<1x1x5x3xf32> to vector<5x3xf32>
    %cst_66 = arith.constant dense<0.000000e+00> : vector<5x320xf32>
    %51 = tpu.matmul %50, %48, %cst_66 {dimension_numbers = #tpu.dot_dimension_numbers<[1], [0], [0], [1], [0, 0, 1, 1], [], []>} : vector<5x3xf32>, vector<3x320xf32>, vector<5x320xf32> -> vector<5x320xf32>
    %52 = arith.addf %46, %51 : vector<5x320xf32>
    %c0_67 = arith.constant 0 : index
    %c0_68 = arith.constant 0 : index
    %c0_69 = arith.constant 0 : index
    %c24 = arith.constant 24 : index
    %53 = vector.load %arg2[%c0_67, %c0_68, %c0_69, %c24] : memref<1x1x3x420xf32, #tpu.memory_space<vmem>>, vector<1x1x3x320xf32>
    %54 = vector.shape_cast %53 : vector<1x1x3x320xf32> to vector<3x320xf32>
    %c0_70 = arith.constant 0 : index
    %c9 = arith.constant 9 : index
    %c0_71 = arith.constant 0 : index
    %c0_72 = arith.constant 0 : index
    %55 = vector.load %arg3[%c0_70, %c9, %c0_71, %c0_72] : memref<1x25x5x3xf32, #tpu.memory_space<vmem>>, vector<1x1x5x3xf32>
    %56 = vector.shape_cast %55 : vector<1x1x5x3xf32> to vector<5x3xf32>
    %cst_73 = arith.constant dense<0.000000e+00> : vector<5x320xf32>
    %57 = tpu.matmul %56, %54, %cst_73 {dimension_numbers = #tpu.dot_dimension_numbers<[1], [0], [0], [1], [0, 0, 1, 1], [], []>} : vector<5x3xf32>, vector<3x320xf32>, vector<5x320xf32> -> vector<5x320xf32>
    %58 = arith.addf %52, %57 : vector<5x320xf32>
    %c0_74 = arith.constant 0 : index
    %c0_75 = arith.constant 0 : index
    %c0_76 = arith.constant 0 : index
    %c40 = arith.constant 40 : index
    %59 = vector.load %arg2[%c0_74, %c0_75, %c0_76, %c40] : memref<1x1x3x420xf32, #tpu.memory_space<vmem>>, vector<1x1x3x320xf32>
    %60 = vector.shape_cast %59 : vector<1x1x3x320xf32> to vector<3x320xf32>
    %c0_77 = arith.constant 0 : index
    %c10 = arith.constant 10 : index
    %c0_78 = arith.constant 0 : index
    %c0_79 = arith.constant 0 : index
    %61 = vector.load %arg3[%c0_77, %c10, %c0_78, %c0_79] : memref<1x25x5x3xf32, #tpu.memory_space<vmem>>, vector<1x1x5x3xf32>
    %62 = vector.shape_cast %61 : vector<1x1x5x3xf32> to vector<5x3xf32>
    %cst_80 = arith.constant dense<0.000000e+00> : vector<5x320xf32>
    %63 = tpu.matmul %62, %60, %cst_80 {dimension_numbers = #tpu.dot_dimension_numbers<[1], [0], [0], [1], [0, 0, 1, 1], [], []>} : vector<5x3xf32>, vector<3x320xf32>, vector<5x320xf32> -> vector<5x320xf32>
    %64 = arith.addf %58, %63 : vector<5x320xf32>
    %c0_81 = arith.constant 0 : index
    %c0_82 = arith.constant 0 : index
    %c0_83 = arith.constant 0 : index
    %c41 = arith.constant 41 : index
    %65 = vector.load %arg2[%c0_81, %c0_82, %c0_83, %c41] : memref<1x1x3x420xf32, #tpu.memory_space<vmem>>, vector<1x1x3x320xf32>
    %66 = vector.shape_cast %65 : vector<1x1x3x320xf32> to vector<3x320xf32>
    %c0_84 = arith.constant 0 : index
    %c11 = arith.constant 11 : index
    %c0_85 = arith.constant 0 : index
    %c0_86 = arith.constant 0 : index
    %67 = vector.load %arg3[%c0_84, %c11, %c0_85, %c0_86] : memref<1x25x5x3xf32, #tpu.memory_space<vmem>>, vector<1x1x5x3xf32>
    %68 = vector.shape_cast %67 : vector<1x1x5x3xf32> to vector<5x3xf32>
    %cst_87 = arith.constant dense<0.000000e+00> : vector<5x320xf32>
    %69 = tpu.matmul %68, %66, %cst_87 {dimension_numbers = #tpu.dot_dimension_numbers<[1], [0], [0], [1], [0, 0, 1, 1], [], []>} : vector<5x3xf32>, vector<3x320xf32>, vector<5x320xf32> -> vector<5x320xf32>
    %70 = arith.addf %64, %69 : vector<5x320xf32>
    %c0_88 = arith.constant 0 : index
    %c0_89 = arith.constant 0 : index
    %c0_90 = arith.constant 0 : index
    %c42 = arith.constant 42 : index
    %71 = vector.load %arg2[%c0_88, %c0_89, %c0_90, %c42] : memref<1x1x3x420xf32, #tpu.memory_space<vmem>>, vector<1x1x3x320xf32>
    %72 = vector.shape_cast %71 : vector<1x1x3x320xf32> to vector<3x320xf32>
    %c0_91 = arith.constant 0 : index
    %c12 = arith.constant 12 : index
    %c0_92 = arith.constant 0 : index
    %c0_93 = arith.constant 0 : index
    %73 = vector.load %arg3[%c0_91, %c12, %c0_92, %c0_93] : memref<1x25x5x3xf32, #tpu.memory_space<vmem>>, vector<1x1x5x3xf32>
    %74 = vector.shape_cast %73 : vector<1x1x5x3xf32> to vector<5x3xf32>
    %cst_94 = arith.constant dense<0.000000e+00> : vector<5x320xf32>
    %75 = tpu.matmul %74, %72, %cst_94 {dimension_numbers = #tpu.dot_dimension_numbers<[1], [0], [0], [1], [0, 0, 1, 1], [], []>} : vector<5x3xf32>, vector<3x320xf32>, vector<5x320xf32> -> vector<5x320xf32>
    %76 = arith.addf %70, %75 : vector<5x320xf32>
    %c0_95 = arith.constant 0 : index
    %c0_96 = arith.constant 0 : index
    %c0_97 = arith.constant 0 : index
    %c43 = arith.constant 43 : index
    %77 = vector.load %arg2[%c0_95, %c0_96, %c0_97, %c43] : memref<1x1x3x420xf32, #tpu.memory_space<vmem>>, vector<1x1x3x320xf32>
    %78 = vector.shape_cast %77 : vector<1x1x3x320xf32> to vector<3x320xf32>
    %c0_98 = arith.constant 0 : index
    %c13 = arith.constant 13 : index
    %c0_99 = arith.constant 0 : index
    %c0_100 = arith.constant 0 : index
    %79 = vector.load %arg3[%c0_98, %c13, %c0_99, %c0_100] : memref<1x25x5x3xf32, #tpu.memory_space<vmem>>, vector<1x1x5x3xf32>
    %80 = vector.shape_cast %79 : vector<1x1x5x3xf32> to vector<5x3xf32>
    %cst_101 = arith.constant dense<0.000000e+00> : vector<5x320xf32>
    %81 = tpu.matmul %80, %78, %cst_101 {dimension_numbers = #tpu.dot_dimension_numbers<[1], [0], [0], [1], [0, 0, 1, 1], [], []>} : vector<5x3xf32>, vector<3x320xf32>, vector<5x320xf32> -> vector<5x320xf32>
    %82 = arith.addf %76, %81 : vector<5x320xf32>
    %c0_102 = arith.constant 0 : index
    %c0_103 = arith.constant 0 : index
    %c0_104 = arith.constant 0 : index
    %c44 = arith.constant 44 : index
    %83 = vector.load %arg2[%c0_102, %c0_103, %c0_104, %c44] : memref<1x1x3x420xf32, #tpu.memory_space<vmem>>, vector<1x1x3x320xf32>
    %84 = vector.shape_cast %83 : vector<1x1x3x320xf32> to vector<3x320xf32>
    %c0_105 = arith.constant 0 : index
    %c14 = arith.constant 14 : index
    %c0_106 = arith.constant 0 : index
    %c0_107 = arith.constant 0 : index
    %85 = vector.load %arg3[%c0_105, %c14, %c0_106, %c0_107] : memref<1x25x5x3xf32, #tpu.memory_space<vmem>>, vector<1x1x5x3xf32>
    %86 = vector.shape_cast %85 : vector<1x1x5x3xf32> to vector<5x3xf32>
    %cst_108 = arith.constant dense<0.000000e+00> : vector<5x320xf32>
    %87 = tpu.matmul %86, %84, %cst_108 {dimension_numbers = #tpu.dot_dimension_numbers<[1], [0], [0], [1], [0, 0, 1, 1], [], []>} : vector<5x3xf32>, vector<3x320xf32>, vector<5x320xf32> -> vector<5x320xf32>
    %88 = arith.addf %82, %87 : vector<5x320xf32>
    %c0_109 = arith.constant 0 : index
    %c0_110 = arith.constant 0 : index
    %c0_111 = arith.constant 0 : index
    %c60 = arith.constant 60 : index
    %89 = vector.load %arg2[%c0_109, %c0_110, %c0_111, %c60] : memref<1x1x3x420xf32, #tpu.memory_space<vmem>>, vector<1x1x3x320xf32>
    %90 = vector.shape_cast %89 : vector<1x1x3x320xf32> to vector<3x320xf32>
    %c0_112 = arith.constant 0 : index
    %c15 = arith.constant 15 : index
    %c0_113 = arith.constant 0 : index
    %c0_114 = arith.constant 0 : index
    %91 = vector.load %arg3[%c0_112, %c15, %c0_113, %c0_114] : memref<1x25x5x3xf32, #tpu.memory_space<vmem>>, vector<1x1x5x3xf32>
    %92 = vector.shape_cast %91 : vector<1x1x5x3xf32> to vector<5x3xf32>
    %cst_115 = arith.constant dense<0.000000e+00> : vector<5x320xf32>
    %93 = tpu.matmul %92, %90, %cst_115 {dimension_numbers = #tpu.dot_dimension_numbers<[1], [0], [0], [1], [0, 0, 1, 1], [], []>} : vector<5x3xf32>, vector<3x320xf32>, vector<5x320xf32> -> vector<5x320xf32>
    %94 = arith.addf %88, %93 : vector<5x320xf32>
    %c0_116 = arith.constant 0 : index
    %c0_117 = arith.constant 0 : index
    %c0_118 = arith.constant 0 : index
    %c61 = arith.constant 61 : index
    %95 = vector.load %arg2[%c0_116, %c0_117, %c0_118, %c61] : memref<1x1x3x420xf32, #tpu.memory_space<vmem>>, vector<1x1x3x320xf32>
    %96 = vector.shape_cast %95 : vector<1x1x3x320xf32> to vector<3x320xf32>
    %c0_119 = arith.constant 0 : index
    %c16 = arith.constant 16 : index
    %c0_120 = arith.constant 0 : index
    %c0_121 = arith.constant 0 : index
    %97 = vector.load %arg3[%c0_119, %c16, %c0_120, %c0_121] : memref<1x25x5x3xf32, #tpu.memory_space<vmem>>, vector<1x1x5x3xf32>
    %98 = vector.shape_cast %97 : vector<1x1x5x3xf32> to vector<5x3xf32>
    %cst_122 = arith.constant dense<0.000000e+00> : vector<5x320xf32>
    %99 = tpu.matmul %98, %96, %cst_122 {dimension_numbers = #tpu.dot_dimension_numbers<[1], [0], [0], [1], [0, 0, 1, 1], [], []>} : vector<5x3xf32>, vector<3x320xf32>, vector<5x320xf32> -> vector<5x320xf32>
    %100 = arith.addf %94, %99 : vector<5x320xf32>
    %c0_123 = arith.constant 0 : index
    %c0_124 = arith.constant 0 : index
    %c0_125 = arith.constant 0 : index
    %c62 = arith.constant 62 : index
    %101 = vector.load %arg2[%c0_123, %c0_124, %c0_125, %c62] : memref<1x1x3x420xf32, #tpu.memory_space<vmem>>, vector<1x1x3x320xf32>
    %102 = vector.shape_cast %101 : vector<1x1x3x320xf32> to vector<3x320xf32>
    %c0_126 = arith.constant 0 : index
    %c17 = arith.constant 17 : index
    %c0_127 = arith.constant 0 : index
    %c0_128 = arith.constant 0 : index
    %103 = vector.load %arg3[%c0_126, %c17, %c0_127, %c0_128] : memref<1x25x5x3xf32, #tpu.memory_space<vmem>>, vector<1x1x5x3xf32>
    %104 = vector.shape_cast %103 : vector<1x1x5x3xf32> to vector<5x3xf32>
    %cst_129 = arith.constant dense<0.000000e+00> : vector<5x320xf32>
    %105 = tpu.matmul %104, %102, %cst_129 {dimension_numbers = #tpu.dot_dimension_numbers<[1], [0], [0], [1], [0, 0, 1, 1], [], []>} : vector<5x3xf32>, vector<3x320xf32>, vector<5x320xf32> -> vector<5x320xf32>
    %106 = arith.addf %100, %105 : vector<5x320xf32>
    %c0_130 = arith.constant 0 : index
    %c0_131 = arith.constant 0 : index
    %c0_132 = arith.constant 0 : index
    %c63 = arith.constant 63 : index
    %107 = vector.load %arg2[%c0_130, %c0_131, %c0_132, %c63] : memref<1x1x3x420xf32, #tpu.memory_space<vmem>>, vector<1x1x3x320xf32>
    %108 = vector.shape_cast %107 : vector<1x1x3x320xf32> to vector<3x320xf32>
    %c0_133 = arith.constant 0 : index
    %c18 = arith.constant 18 : index
    %c0_134 = arith.constant 0 : index
    %c0_135 = arith.constant 0 : index
    %109 = vector.load %arg3[%c0_133, %c18, %c0_134, %c0_135] : memref<1x25x5x3xf32, #tpu.memory_space<vmem>>, vector<1x1x5x3xf32>
    %110 = vector.shape_cast %109 : vector<1x1x5x3xf32> to vector<5x3xf32>
    %cst_136 = arith.constant dense<0.000000e+00> : vector<5x320xf32>
    %111 = tpu.matmul %110, %108, %cst_136 {dimension_numbers = #tpu.dot_dimension_numbers<[1], [0], [0], [1], [0, 0, 1, 1], [], []>} : vector<5x3xf32>, vector<3x320xf32>, vector<5x320xf32> -> vector<5x320xf32>
    %112 = arith.addf %106, %111 : vector<5x320xf32>
    %c0_137 = arith.constant 0 : index
    %c0_138 = arith.constant 0 : index
    %c0_139 = arith.constant 0 : index
    %c64 = arith.constant 64 : index
    %113 = vector.load %arg2[%c0_137, %c0_138, %c0_139, %c64] : memref<1x1x3x420xf32, #tpu.memory_space<vmem>>, vector<1x1x3x320xf32>
    %114 = vector.shape_cast %113 : vector<1x1x3x320xf32> to vector<3x320xf32>
    %c0_140 = arith.constant 0 : index
    %c19 = arith.constant 19 : index
    %c0_141 = arith.constant 0 : index
    %c0_142 = arith.constant 0 : index
    %115 = vector.load %arg3[%c0_140, %c19, %c0_141, %c0_142] : memref<1x25x5x3xf32, #tpu.memory_space<vmem>>, vector<1x1x5x3xf32>
    %116 = vector.shape_cast %115 : vector<1x1x5x3xf32> to vector<5x3xf32>
    %cst_143 = arith.constant dense<0.000000e+00> : vector<5x320xf32>
    %117 = tpu.matmul %116, %114, %cst_143 {dimension_numbers = #tpu.dot_dimension_numbers<[1], [0], [0], [1], [0, 0, 1, 1], [], []>} : vector<5x3xf32>, vector<3x320xf32>, vector<5x320xf32> -> vector<5x320xf32>
    %118 = arith.addf %112, %117 : vector<5x320xf32>
    %c0_144 = arith.constant 0 : index
    %c0_145 = arith.constant 0 : index
    %c0_146 = arith.constant 0 : index
    %c80 = arith.constant 80 : index
    %119 = vector.load %arg2[%c0_144, %c0_145, %c0_146, %c80] : memref<1x1x3x420xf32, #tpu.memory_space<vmem>>, vector<1x1x3x320xf32>
    %120 = vector.shape_cast %119 : vector<1x1x3x320xf32> to vector<3x320xf32>
    %c0_147 = arith.constant 0 : index
    %c20_148 = arith.constant 20 : index
    %c0_149 = arith.constant 0 : index
    %c0_150 = arith.constant 0 : index
    %121 = vector.load %arg3[%c0_147, %c20_148, %c0_149, %c0_150] : memref<1x25x5x3xf32, #tpu.memory_space<vmem>>, vector<1x1x5x3xf32>
    %122 = vector.shape_cast %121 : vector<1x1x5x3xf32> to vector<5x3xf32>
    %cst_151 = arith.constant dense<0.000000e+00> : vector<5x320xf32>
    %123 = tpu.matmul %122, %120, %cst_151 {dimension_numbers = #tpu.dot_dimension_numbers<[1], [0], [0], [1], [0, 0, 1, 1], [], []>} : vector<5x3xf32>, vector<3x320xf32>, vector<5x320xf32> -> vector<5x320xf32>
    %124 = arith.addf %118, %123 : vector<5x320xf32>
    %c0_152 = arith.constant 0 : index
    %c0_153 = arith.constant 0 : index
    %c0_154 = arith.constant 0 : index
    %c81 = arith.constant 81 : index
    %125 = vector.load %arg2[%c0_152, %c0_153, %c0_154, %c81] : memref<1x1x3x420xf32, #tpu.memory_space<vmem>>, vector<1x1x3x320xf32>
    %126 = vector.shape_cast %125 : vector<1x1x3x320xf32> to vector<3x320xf32>
    %c0_155 = arith.constant 0 : index
    %c21_156 = arith.constant 21 : index
    %c0_157 = arith.constant 0 : index
    %c0_158 = arith.constant 0 : index
    %127 = vector.load %arg3[%c0_155, %c21_156, %c0_157, %c0_158] : memref<1x25x5x3xf32, #tpu.memory_space<vmem>>, vector<1x1x5x3xf32>
    %128 = vector.shape_cast %127 : vector<1x1x5x3xf32> to vector<5x3xf32>
    %cst_159 = arith.constant dense<0.000000e+00> : vector<5x320xf32>
    %129 = tpu.matmul %128, %126, %cst_159 {dimension_numbers = #tpu.dot_dimension_numbers<[1], [0], [0], [1], [0, 0, 1, 1], [], []>} : vector<5x3xf32>, vector<3x320xf32>, vector<5x320xf32> -> vector<5x320xf32>
    %130 = arith.addf %124, %129 : vector<5x320xf32>
    %c0_160 = arith.constant 0 : index
    %c0_161 = arith.constant 0 : index
    %c0_162 = arith.constant 0 : index
    %c82 = arith.constant 82 : index
    %131 = vector.load %arg2[%c0_160, %c0_161, %c0_162, %c82] : memref<1x1x3x420xf32, #tpu.memory_space<vmem>>, vector<1x1x3x320xf32>
    %132 = vector.shape_cast %131 : vector<1x1x3x320xf32> to vector<3x320xf32>
    %c0_163 = arith.constant 0 : index
    %c22_164 = arith.constant 22 : index
    %c0_165 = arith.constant 0 : index
    %c0_166 = arith.constant 0 : index
    %133 = vector.load %arg3[%c0_163, %c22_164, %c0_165, %c0_166] : memref<1x25x5x3xf32, #tpu.memory_space<vmem>>, vector<1x1x5x3xf32>
    %134 = vector.shape_cast %133 : vector<1x1x5x3xf32> to vector<5x3xf32>
    %cst_167 = arith.constant dense<0.000000e+00> : vector<5x320xf32>
    %135 = tpu.matmul %134, %132, %cst_167 {dimension_numbers = #tpu.dot_dimension_numbers<[1], [0], [0], [1], [0, 0, 1, 1], [], []>} : vector<5x3xf32>, vector<3x320xf32>, vector<5x320xf32> -> vector<5x320xf32>
    %136 = arith.addf %130, %135 : vector<5x320xf32>
    %c0_168 = arith.constant 0 : index
    %c0_169 = arith.constant 0 : index
    %c0_170 = arith.constant 0 : index
    %c83 = arith.constant 83 : index
    %137 = vector.load %arg2[%c0_168, %c0_169, %c0_170, %c83] : memref<1x1x3x420xf32, #tpu.memory_space<vmem>>, vector<1x1x3x320xf32>
    %138 = vector.shape_cast %137 : vector<1x1x3x320xf32> to vector<3x320xf32>
    %c0_171 = arith.constant 0 : index
    %c23_172 = arith.constant 23 : index
    %c0_173 = arith.constant 0 : index
    %c0_174 = arith.constant 0 : index
    %139 = vector.load %arg3[%c0_171, %c23_172, %c0_173, %c0_174] : memref<1x25x5x3xf32, #tpu.memory_space<vmem>>, vector<1x1x5x3xf32>
    %140 = vector.shape_cast %139 : vector<1x1x5x3xf32> to vector<5x3xf32>
    %cst_175 = arith.constant dense<0.000000e+00> : vector<5x320xf32>
    %141 = tpu.matmul %140, %138, %cst_175 {dimension_numbers = #tpu.dot_dimension_numbers<[1], [0], [0], [1], [0, 0, 1, 1], [], []>} : vector<5x3xf32>, vector<3x320xf32>, vector<5x320xf32> -> vector<5x320xf32>
    %142 = arith.addf %136, %141 : vector<5x320xf32>
    %c0_176 = arith.constant 0 : index
    %c0_177 = arith.constant 0 : index
    %c0_178 = arith.constant 0 : index
    %c84 = arith.constant 84 : index
    %143 = vector.load %arg2[%c0_176, %c0_177, %c0_178, %c84] : memref<1x1x3x420xf32, #tpu.memory_space<vmem>>, vector<1x1x3x320xf32>
    %144 = vector.shape_cast %143 : vector<1x1x3x320xf32> to vector<3x320xf32>
    %c0_179 = arith.constant 0 : index
    %c24_180 = arith.constant 24 : index
    %c0_181 = arith.constant 0 : index
    %c0_182 = arith.constant 0 : index
    %145 = vector.load %arg3[%c0_179, %c24_180, %c0_181, %c0_182] : memref<1x25x5x3xf32, #tpu.memory_space<vmem>>, vector<1x1x5x3xf32>
    %146 = vector.shape_cast %145 : vector<1x1x5x3xf32> to vector<5x3xf32>
    %cst_183 = arith.constant dense<0.000000e+00> : vector<5x320xf32>
    %147 = tpu.matmul %146, %144, %cst_183 {dimension_numbers = #tpu.dot_dimension_numbers<[1], [0], [0], [1], [0, 0, 1, 1], [], []>} : vector<5x3xf32>, vector<3x320xf32>, vector<5x320xf32> -> vector<5x320xf32>
    %148 = arith.addf %142, %147 : vector<5x320xf32>
    %c0_184 = arith.constant 0 : index
    %c0_185 = arith.constant 0 : index
    %c0_186 = arith.constant 0 : index
    %149 = vector.load %arg4[%c0_184, %c0_185, %c0_186] : memref<1x5x1xf32, #tpu.memory_space<vmem>>, vector<1x5x1xf32>
    %150 = vector.shape_cast %149 : vector<1x5x1xf32> to vector<5x1xf32>
    %151 = vector.broadcast %150 : vector<5x1xf32> to vector<5x320xf32>
    %152 = arith.addf %148, %151 : vector<5x320xf32>
    %c0_187 = arith.constant 0 : index
    %c0_188 = arith.constant 0 : index
    %c0_189 = arith.constant 0 : index
    %c0_190 = arith.constant 0 : index
    %153 = vector.load %arg5[%c0_187, %c0_188, %c0_189, %c0_190] : memref<1x1x5x320xf32, #tpu.memory_space<vmem>>, vector<1x1x5x320xf32>
    %154 = vector.shape_cast %153 : vector<1x1x5x320xf32> to vector<5x320xf32>
    %155 = vector.shape_cast %152 : vector<5x320xf32> to vector<1x1x5x320xf32>
    tpu.vector_store %arg5[%c0_187, %c0_188, %c0_189, %c0_190], %155 {strides = array<i32>} : memref<1x1x5x320xf32, #tpu.memory_space<vmem>>, vector<1x1x5x320xf32>,
    return
  }
  func.func @transform_0(%arg0: i32, %arg1: i32) -> (i32, i32, i32, i32) {
    %c0_i32 = arith.constant 0 : i32
    %c0_i32_0 = arith.constant 0 : i32
    %c0_i32_1 = arith.constant 0 : i32
    return %arg0, %arg1, %c0_i32, %c0_i32_0 : i32, i32, i32, i32
  }
  func.func @transform_1(%arg0: i32, %arg1: i32) -> (i32, i32, i32, i32) {
    %c0_i32 = arith.constant 0 : i32
    %c0_i32_0 = arith.constant 0 : i32
    %c0_i32_1 = arith.constant 0 : i32
    %c0_i32_2 = arith.constant 0 : i32
    return %arg1, %c0_i32, %c0_i32_0, %c0_i32_1 : i32, i32, i32, i32
  }
  func.func @transform_2(%arg0: i32, %arg1: i32) -> (i32, i32, i32) {
    %c0_i32 = arith.constant 0 : i32
    %c0_i32_0 = arith.constant 0 : i32
    %c0_i32_1 = arith.constant 0 : i32
    return %arg1, %c0_i32, %c0_i32_0 : i32, i32, i32
  }
  func.func @transform_3(%arg0: i32, %arg1: i32) -> (i32, i32, i32, i32) {
    %c0_i32 = arith.constant 0 : i32
    %c0_i32_0 = arith.constant 0 : i32
    %c0_i32_1 = arith.constant 0 : i32
    return %arg0, %arg1, %c0_i32, %c0_i32_0 : i32, i32, i32, i32
  }
}

module attributes {stable_mosaic.version = 11 : i64} {
  func.func @_conv_branch_kernel(%arg0: i32, %arg1: i32, %arg2: memref<1x1x2x256xf32, #tpu.memory_space<vmem>>, %arg3: memref<1x1x4x2xf32, #tpu.memory_space<vmem>>, %arg4: memref<1x4x1xf32, #tpu.memory_space<vmem>>, %arg5: memref<1x1x4x256xf32, #tpu.memory_space<vmem>>) attributes {dimension_semantics = [#tpu.dimension_semantics<parallel>, #tpu.dimension_semantics<parallel>], iteration_bounds = array<i64: 2, 1>, scalar_prefetch = 0 : i64, scratch_operands = 0 : i64, tpu.core_type = #tpu.core_type<tc>, window_params = [{transform_indices = @transform_0, window_bounds = array<i64: 1, 1, 2, 256>}, {transform_indices = @transform_1, window_bounds = array<i64: 1, 1, 4, 2>}, {transform_indices = @transform_2, window_bounds = array<i64: 1, 4, 1>}, {transform_indices = @transform_3, window_bounds = array<i64: 1, 1, 4, 256>}]} {
    %c0 = arith.constant 0 : index
    %c0_0 = arith.constant 0 : index
    %c0_1 = arith.constant 0 : index
    %c0_2 = arith.constant 0 : index
    %0 = vector.load %arg2[%c0, %c0_0, %c0_1, %c0_2] : memref<1x1x2x256xf32, #tpu.memory_space<vmem>>, vector<1x1x2x256xf32>
    %1 = vector.shape_cast %0 : vector<1x1x2x256xf32> to vector<2x256xf32>
    %c0_3 = arith.constant 0 : index
    %c0_4 = arith.constant 0 : index
    %c0_5 = arith.constant 0 : index
    %c0_6 = arith.constant 0 : index
    %2 = vector.load %arg3[%c0_3, %c0_4, %c0_5, %c0_6] : memref<1x1x4x2xf32, #tpu.memory_space<vmem>>, vector<1x1x4x2xf32>
    %3 = vector.shape_cast %2 : vector<1x1x4x2xf32> to vector<4x2xf32>
    %cst = arith.constant dense<0.000000e+00> : vector<4x256xf32>
    %4 = tpu.matmul %3, %1, %cst {dimension_numbers = #tpu.dot_dimension_numbers<[1], [0], [0], [1], [0, 0, 1, 1], [], []>} : vector<4x2xf32>, vector<2x256xf32>, vector<4x256xf32> -> vector<4x256xf32>
    %c0_7 = arith.constant 0 : index
    %c0_8 = arith.constant 0 : index
    %c0_9 = arith.constant 0 : index
    %5 = vector.load %arg4[%c0_7, %c0_8, %c0_9] : memref<1x4x1xf32, #tpu.memory_space<vmem>>, vector<1x4x1xf32>
    %6 = vector.shape_cast %5 : vector<1x4x1xf32> to vector<4x1xf32>
    %7 = vector.broadcast %6 : vector<4x1xf32> to vector<4x256xf32>
    %8 = arith.addf %4, %7 : vector<4x256xf32>
    %c0_10 = arith.constant 0 : index
    %c0_11 = arith.constant 0 : index
    %c0_12 = arith.constant 0 : index
    %c0_13 = arith.constant 0 : index
    %9 = vector.load %arg5[%c0_10, %c0_11, %c0_12, %c0_13] : memref<1x1x4x256xf32, #tpu.memory_space<vmem>>, vector<1x1x4x256xf32>
    %10 = vector.shape_cast %9 : vector<1x1x4x256xf32> to vector<4x256xf32>
    %11 = vector.shape_cast %8 : vector<4x256xf32> to vector<1x1x4x256xf32>
    tpu.vector_store %arg5[%c0_10, %c0_11, %c0_12, %c0_13], %11 {strides = array<i32>} : memref<1x1x4x256xf32, #tpu.memory_space<vmem>>, vector<1x1x4x256xf32>,
    return
  }
  func.func @transform_0(%arg0: i32, %arg1: i32) -> (i32, i32, i32, i32) {
    %c0_i32 = arith.constant 0 : i32
    %c0_i32_0 = arith.constant 0 : i32
    %c0_i32_1 = arith.constant 0 : i32
    return %arg0, %arg1, %c0_i32, %c0_i32_0 : i32, i32, i32, i32
  }
  func.func @transform_1(%arg0: i32, %arg1: i32) -> (i32, i32, i32, i32) {
    %c0_i32 = arith.constant 0 : i32
    %c0_i32_0 = arith.constant 0 : i32
    %c0_i32_1 = arith.constant 0 : i32
    %c0_i32_2 = arith.constant 0 : i32
    return %arg1, %c0_i32, %c0_i32_0, %c0_i32_1 : i32, i32, i32, i32
  }
  func.func @transform_2(%arg0: i32, %arg1: i32) -> (i32, i32, i32) {
    %c0_i32 = arith.constant 0 : i32
    %c0_i32_0 = arith.constant 0 : i32
    %c0_i32_1 = arith.constant 0 : i32
    return %arg1, %c0_i32, %c0_i32_0 : i32, i32, i32
  }
  func.func @transform_3(%arg0: i32, %arg1: i32) -> (i32, i32, i32, i32) {
    %c0_i32 = arith.constant 0 : i32
    %c0_i32_0 = arith.constant 0 : i32
    %c0_i32_1 = arith.constant 0 : i32
    return %arg0, %arg1, %c0_i32, %c0_i32_0 : i32, i32, i32, i32
  }
}

</mosaic_0001>

<bundles_post_ra>
// kernel: _lambda_.5
= control target key start
LH: loop header
LB: loop body
LE: loop exit
PB: predicated region body
PF: predicated region fallthrough
CT: control target
= control target key end

     0   :  { %s558_s12 = smov 0   ;;  %s560_s13 = smov 0   ;;  %s597_s0 = inlined_call_operand.vmem [shape: f32[2,1,2,256], index: 0, kind: input, shape index: {}]   ;;  %s598_s1 = inlined_call_operand.vmem [shape: f32[1,1,4,2], index: 1, kind: input, shape index: {}]   ;;  %s599_s2 = inlined_call_operand.vmem [shape: f32[1,4,1], index: 2, kind: input, shape index: {}]   ;;  %s600_s3 = inlined_call_operand.vmem [shape: f32[2,1,4,256], index: 3, kind: output, shape index: {}]  }
   0x1   :  { %s562_s14 = smov 0  }
   0x2 LB: > { %s25_s15 = sadd.s32 1, %s530_s13  ;;  %p472_p0 = scmp.ge.s32.totalorder %s534_s14, 1  ;;  %s534_s14 = sphi %s562_s14, %s13_s14   ;;  %s530_s13 = sphi %s560_s13, %s602_s13   ;;  %s526_s12 = sphi %s558_s12, %s601_s12  }
   0x3   : > { %p27_p1 = scmp.ge.s32.totalorder %s25_s15, 2  ;;  %p175_p2 = scmp.lt.s32.totalorder %s534_s14, 3 }
   0x5   : > { %s604_s15 = smov (%p27_p1, %s25_s15), 0  ;;  %p176_p3 = pnand %p472_p0, %p175_p2 }
   0x6   : > { %p215_p4 = scmp.lt.s32.totalorder (!%p176_p3), %s526_s12, 1  ;;  %v536_v0 = vmov (!%p176_p3), 0.0   ;;  %v243_v1 = vld [vmem:[%s599_s2] sm:$0xf] (!%p176_p3)  ;;  %v537_v2 = vmov (!%p176_p3), 0   ;;  %vm262_vm0 = vcmask (!%p176_p3), 1041408  }
   0x7   : > { %179 = sbr.rel (%p176_p3) target bundleno = 240 (0xf0), region = 32  ;;  %331 = vmatprep.mubr.f32.mxu0 (!%p176_p3), %v536_v0  ;;  %511 = vset.pattern.permute.xlu0 (!%p176_p3), %v537_v2  ;;  %v242_v5 = vld [vmem:[%s598_s1] sm:$0xf] (!%p176_p3)  ;;  %vm258_vm1 = vcmask (!%p176_p3), 15360  }
   0x8   : > { %246 = vperm.xlu0 (!%p176_p3), %511, %v243_v1  }
   0xe   : > { %s606_s12 = smov (!%p215_p4, %s526_s12), 1 }
   0xf   : > { %s483_s18 = sshll.u32 %s606_s12, 2  ;;  %s484_s24 = sshll.u32 %s606_s12, 3 }
  0x10   : > { %s223_s21 = scalar_lea.vmem %s597_s0, %s483_s18  ;;  %s240_s27 = scalar_lea.vmem %s600_s3, %s484_s24 }
  0x11   : > { %v477_v3 = vld.sshfl [vmem:[%s223_s21] sm:$0x33 pattern:$0x76325410] }
  0x12   : > { %v257_v4 = vcombine.high %v477_v3, %v477_v3 }
  0x14   : > { %478 = vmatprep.subr.msk.mxu0 %vm262_vm0, %v257_v4 }
  0x15   : > { %479 = vmatpush1.msk.msra.mxu0 %vm262_vm0, %v477_v3 }
  0x16   : > { %480 = vmatmul.mubr.msk.f32.vlgmr.msra.gmra.mrb[0].mxu0 %vm258_vm1, %v242_v5 }
  0x87   : > { %v247_v6 = vpop.permute.xlu0 %246 }
  0xe9   : > { %v333_v7 = vpop.f32.mrb[0].mxu0 }
  0xea   : > { %v334_v8 = vadd.f32 %v333_v7, %v247_v6  ;;  %v335_v9 = vpop.f32.mrb[1].mxu0 }
  0xeb   : > { %v336_v10 = vadd.f32 %v335_v9, %v247_v6 }
  0xed   : > { %v340_v11 = vcombine.low %v334_v8, %v336_v10 }
  0xef   : > { %342 = vst [vmem:[%s240_s27] sm:$0xff] %v340_v11 }
  0xf0 PF: > { %s13_s14 = sadd.s32 1, %s534_s14   ;;  %s601_s12 = smov %s530_s13 }
  0xf1   : > { %p10_p5 = scmp.ge.s32.totalorder %s13_s14, 4   ;;  %s602_s13 = smov %s604_s15 }
  0xf3   :  { %12 = sbr.rel (!%p10_p5) target bundleno = 2 (0x2), region = 68 }

// kernel: _lambda_.3
= control target key start
LH: loop header
LB: loop body
LE: loop exit
PB: predicated region body
PF: predicated region fallthrough
CT: control target
= control target key end

     0   :  { %s2235_s12 = smov 0   ;;  %s2237_s13 = smov 0   ;;  %s2435_s0 = inlined_call_operand.vmem [shape: f32[2,1,2,342], index: 0, kind: input, shape index: {}]   ;;  %s2436_s1 = inlined_call_operand.vmem [shape: f32[1,9,3,2], index: 1, kind: input, shape index: {}]   ;;  %s2437_s2 = inlined_call_operand.vmem [shape: f32[1,3,1], index: 2, kind: input, shape index: {}]   ;;  %s2438_s3 = inlined_call_operand.vmem [shape: f32[2,1,3,288], index: 3, kind: output, shape index: {}]  }
   0x1   :  { %s2239_s14 = smov 0  }
   0x2 LB: > { %s25_s15 = sadd.s32 1, %s2197_s13  ;;  %p1995_p0 = scmp.ge.s32.totalorder %s2201_s14, 1  ;;  %s2201_s14 = sphi %s2239_s14, %s13_s14   ;;  %s2197_s13 = sphi %s2237_s13, %s2440_s13   ;;  %s2193_s12 = sphi %s2235_s12, %s2439_s12  }
   0x3   : > { %p27_p1 = scmp.ge.s32.totalorder %s25_s15, 2  ;;  %p176_p2 = scmp.lt.s32.totalorder %s2201_s14, 3 }
   0x5   : > { %s2442_s15 = smov (%p27_p1, %s25_s15), 0  ;;  %p177_p3 = pnand %p1995_p0, %p176_p2 }
   0x6   : > { %p217_p4 = scmp.lt.s32.totalorder (!%p177_p3), %s2193_s12, 1  ;;  %v253_v0 = vlaneseq (!%p177_p3)  ;;  %v2203_v1 = vmov (!%p177_p3), 1983009808   ;;  %v2204_v3 = vmov (!%p177_p3), 0.0   ;;  %s2205_s20 = smov (!%p177_p3), 127   ;;  %vm2207_vm0 = vmmov (!%p177_p3), 0  }
   0x7   : > { %180 = sbr.rel (%p177_p3) target bundleno = 427 (0x1ab), region = 32  ;;  %v251_v2 = vunpack.c.l.s4 (!%p177_p3), %v2203_v1  ;;  %2071 = vmatprep.subr.mxu1 (!%p177_p3), %v2204_v3  ;;  %349 = vmatprep.mubr.f32.mxu0 (!%p177_p3), %v2204_v3  ;;  %s2206_s21 = smov (!%p177_p3), 126   ;;  %v1850_v47 = vld [vmem:[%s2437_s2] sm:$0x7] (!%p177_p3)  ;;  %v2214_v48 = vmov (!%p177_p3), 0   ;;  %vm278_vm1 = vcmask (!%p177_p3), 1041408  }
   0x8   : > { %v254_v4 = vshrl.u32 (!%p177_p3), %v253_v0, 7  ;;  %2073 = vmatprep.mubr.msk.f32.mxu1 (!%p177_p3), %vm2207_vm0, %v2204_v3  ;;  %s2208_s22 = smov (!%p177_p3), 110   ;;  %s2209_s23 = smov (!%p177_p3), 109   ;;  %2170 = vset.pattern.permute.xlu0 (!%p177_p3), %v2214_v48  ;;  %vm271_vm2 = vcmask (!%p177_p3), 1039360   ;;  %v1998_v54 = vld [vmem:[%s2436_s1 + $0x4] sm:$0x7] (!%p177_p3) }
   0x9   : > { %v252_v5 = vunpack.c.0.s8 (!%p177_p3), %v251_v2  ;;  %s2210_s24 = smov (!%p177_p3), 108   ;;  %s2211_s25 = smov (!%p177_p3), 92   ;;  %vm274_vm3 = vcmask (!%p177_p3), 15360   ;;  %vm602_vm4 = vcmask (!%p177_p3), 1031168   ;;  %v245_v60 = vld [vmem:[%s2436_s1] sm:$0x7] (!%p177_p3) }
   0xa   : > { %s2212_s26 = smov (!%p177_p3), 91   ;;  %s2213_s27 = smov (!%p177_p3), 90   ;;  %vm784_vm5 = vcmask (!%p177_p3), 900096   ;;  %v2009_v1 = vld [vmem:[%s2436_s1 + $0x8] sm:$0x7] (!%p177_p3)  ;;  %vm966_vm6 = vcmask (!%p177_p3), 891904  }
   0xb   : > { %v2258_v6 = vsub.s32 (!%p177_p3), %v252_v5, %v254_v4  ;;  %v2015_v5 = vld [vmem:[%s2436_s1 + $0xc] sm:$0x7] (!%p177_p3)  ;;  %vm1148_vm7 = vcmask (!%p177_p3), 883712   ;;  %vm1330_vm8 = vcmask (!%p177_p3), 752640   ;;  %vm1512_vm9 = vcmask (!%p177_p3), 744448  }
   0xc   : > { %vm1694_vm10 = vcmask (!%p177_p3), 736256   ;;  %vm1864_vm11 = vcmask (!%p177_p3), 256000  }
   0xe   : > { %s2444_s12 = smov (!%p217_p4, %s2193_s12), 1 }
   0xf   : > { %s2132_s16 = smul.u32 6, %s2444_s12 }
  0x11   : > { %s2263_s19 = scalar_lea.vmem %s2435_s0, %s2132_s16 }
  0x12   : > { %v244_v7 = vld [vmem:[%s2263_s19] sm:$0x3f] }
  0x13   : > { %v576_v8 = vld [vmem:[%s2263_s19] sm:$0x3f]  ;;  %v2268_v9 = vrot.slane %v244_v7, %v2258_v6  ;;  %v249_v10 = vcombine.high %v244_v7, %v244_v7  ;;  %v2021_v7 = vld [vmem:[%s2436_s1 + $0x10] sm:$0x7] }
  0x14   : > { %v587_v11 = vrot.slane %v576_v8, %v2258_v6  ;;  %v580_v15 = vcombine.high %v576_v8, %v576_v8  ;;  %v758_v16 = vld [vmem:[%s2263_s19] sm:$0x3f] }
  0x15   : > { %265 = vrot.lane.b32.xlu1 %v2268_v9, %s2205_s20  ;;  %v2274_v12 = vcombine.high %v2268_v9, %v2268_v9  ;;  %v2278_v14 = vrot.slane %v249_v10, %v2258_v6  ;;  %v762_v17 = vcombine.high %v758_v16, %v758_v16  ;;  %v940_v18 = vld [vmem:[%s2263_s19] sm:$0x3f]  ;;  %v769_v20 = vrot.slane %v758_v16, %v2258_v6 }
  0x16   : > { %v595_v13 = vcombine.high %v587_v11, %v587_v11  ;;  %v594_v19 = vrot.slane %v580_v15, %v2258_v6  ;;  %v951_v22 = vrot.slane %v940_v18, %v2258_v6  ;;  %v944_v25 = vcombine.high %v940_v18, %v940_v18  ;;  %v1122_v26 = vld [vmem:[%s2263_s19] sm:$0x3f] }
  0x17   : > { %267 = vrot.lane.b32.xlu0 %v2274_v12, %s2205_s20  ;;  %v776_v21 = vrot.slane %v762_v17, %v2258_v6  ;;  %v777_v23 = vcombine.high %v769_v20, %v769_v20  ;;  %v1126_v27 = vcombine.high %v1122_v26, %v1122_v26  ;;  %v1304_v28 = vld [vmem:[%s2263_s19] sm:$0x3f]  ;;  %v1133_v30 = vrot.slane %v1122_v26, %v2258_v6 }
  0x18   : > { %v959_v24 = vcombine.high %v951_v22, %v951_v22  ;;  %v958_v29 = vrot.slane %v944_v25, %v2258_v6  ;;  %v1315_v32 = vrot.slane %v1304_v28, %v2258_v6  ;;  %v1308_v35 = vcombine.high %v1304_v28, %v1304_v28  ;;  %v1486_v36 = vld [vmem:[%s2263_s19] sm:$0x3f] }
  0x19   : > { %598 = vrot.lane.b32.xlu1 %v595_v13, %s2206_s21  ;;  %v1140_v31 = vrot.slane %v1126_v27, %v2258_v6  ;;  %v1141_v33 = vcombine.high %v1133_v30, %v1133_v30  ;;  %v1490_v37 = vcombine.high %v1486_v36, %v1486_v36  ;;  %v1497_v39 = vrot.slane %v1486_v36, %v2258_v6  ;;  %v1668_v40 = vld [vmem:[%s2263_s19] sm:$0x3f] }
  0x1a   : > { %v1323_v34 = vcombine.high %v1315_v32, %v1315_v32  ;;  %v1322_v38 = vrot.slane %v1308_v35, %v2258_v6  ;;  %v1679_v42 = vrot.slane %v1668_v40, %v2258_v6  ;;  %v1672_v45 = vcombine.high %v1668_v40, %v1668_v40  ;;  %v2045_v26 = vld [vmem:[%s2436_s1 + $0x20] sm:$0x7] }
  0x1b   : > { %269 = vrot.lane.b32.xlu0 %v2278_v14, %s2205_s20  ;;  %v1504_v41 = vrot.slane %v1490_v37, %v2258_v6  ;;  %v1505_v43 = vcombine.high %v1497_v39, %v1497_v39 }
  0x1c   : > { %v1687_v44 = vcombine.high %v1679_v42, %v1679_v42  ;;  %v1686_v46 = vrot.slane %v1672_v45, %v2258_v6 }
  0x1d   : > { %596 = vrot.lane.b32.xlu1 %v587_v11, %s2206_s21 }
  0x1f   : > { %600 = vrot.lane.b32.xlu0 %v594_v19, %s2206_s21  ;;  %v2033_v19 = vld [vmem:[%s2436_s1 + $0x18] sm:$0x7] }
  0x21   : > { %782 = vrot.lane.b32.xlu1 %v776_v21, %s2208_s22 }
  0x23   : > { %780 = vrot.lane.b32.xlu0 %v777_v23, %s2208_s22 }
  0x25   : > { %962 = vrot.lane.b32.xlu1 %v959_v24, %s2209_s23 }
  0x27   : > { %778 = vrot.lane.b32.xlu0 %v769_v20, %s2208_s22 }
  0x29   : > { %960 = vrot.lane.b32.xlu1 %v951_v22, %s2209_s23  ;;  %v2039_v22 = vld [vmem:[%s2436_s1 + $0x1c] sm:$0x7] }
  0x2b   : > { %964 = vrot.lane.b32.xlu0 %v958_v29, %s2209_s23 }
  0x2d   : > { %1146 = vrot.lane.b32.xlu1 %v1140_v31, %s2210_s24 }
  0x2f   : > { %1144 = vrot.lane.b32.xlu0 %v1141_v33, %s2210_s24 }
  0x31   : > { %1326 = vrot.lane.b32.xlu1 %v1323_v34, %s2211_s25 }
  0x33   : > { %1142 = vrot.lane.b32.xlu0 %v1133_v30, %s2210_s24 }
  0x35   : > { %1324 = vrot.lane.b32.xlu1 %v1315_v32, %s2211_s25 }
  0x37   : > { %1328 = vrot.lane.b32.xlu0 %v1322_v38, %s2211_s25  ;;  %s2133_s25 = smul.u32 12, %s2444_s12 }
  0x39   : > { %1510 = vrot.lane.b32.xlu1 %v1504_v41, %s2212_s26  ;;  %s243_s28 = scalar_lea.vmem %s2438_s3, %s2133_s25 }
  0x3b   : > { %1508 = vrot.lane.b32.xlu0 %v1505_v43, %s2212_s26 }
  0x3d   : > { %1690 = vrot.lane.b32.xlu1 %v1687_v44, %s2213_s27 }
  0x3f   : > { %1506 = vrot.lane.b32.xlu0 %v1497_v39, %s2212_s26 }
  0x41   : > { %1688 = vrot.lane.b32.xlu1 %v1679_v42, %s2213_s27 }
  0x43   : > { %1692 = vrot.lane.b32.xlu0 %v1686_v46, %s2213_s27 }
  0x47   : > { %1853 = vperm.xlu0 %2170, %v1850_v47  }
  0x87   : > { %v266_v49 = vpop.permute.xlu1 %265 }
  0x89   : > { %v268_v50 = vpop.permute.xlu0 %267 }
  0x8a   : > { %v272_v55 = vsel %vm271_vm2, %v266_v49, %v268_v50 }
  0x8b   : > { %v599_v51 = vpop.permute.xlu1 %598 }
  0x8d   : > { %v270_v52 = vpop.permute.xlu0 %269 }
  0x8e   : > { %2072 = vmatpush3.msk.msra.mxu1 %vm278_vm1, %v270_v52  ;;  %v273_v53 = vsel %vm271_vm2, %v268_v50, %v270_v52 }
  0x8f   : > { %1999 = vmatprep.subr.msk.mxu0 %vm278_vm1, %v273_v53  ;;  %v597_v56 = vpop.permute.xlu1 %596  ;;  %2074 = vmatmul.mubr.msk.f32.vlgmr.msra.gmra.mrb[0].mxu1 %vm274_vm3, %v1998_v54 }
  0x90   : > { %2000 = vmatpush1.msk.msra.mxu0 %vm278_vm1, %v272_v55  ;;  %2076 = vmatprep.subr.mxu1 %v2204_v3  ;;  %v603_v62 = vsel %vm602_vm4, %v597_v56, %v599_v51 }
  0x91   : > { %2001 = vmatmul.mubr.msk.f32.vlgmr.msra.gmra.mrb[0].mxu0 %vm274_vm3, %v1998_v54  ;;  %2004 = vmatprep.subr.msk.mxu0 %vm278_vm1, %v2274_v12  ;;  %v601_v57 = vpop.permute.xlu0 %600  ;;  %v2027_v12 = vld [vmem:[%s2436_s1 + $0x14] sm:$0x7] }
  0x92   : > { %2005 = vmatpush1.msk.msra.mxu0 %vm278_vm1, %v2268_v9  ;;  %v604_v58 = vsel %vm602_vm4, %v599_v51, %v601_v57  ;;  %2077 = vmatpush3.msk.msra.mxu1 %vm278_vm1, %v2278_v14 }
  0x93   : > { %2010 = vmatprep.subr.msk.mxu0 %vm278_vm1, %v604_v58  ;;  %2078 = vmatprep.mubr.msk.f32.mxu1 %vm2207_vm0, %v2204_v3  ;;  %v783_v59 = vpop.permute.xlu1 %782 }
  0x94   : > { %2081 = vmatprep.subr.mxu1 %v2204_v3  ;;  %499 = vmatprep.mubr.f32.mxu0 %v2204_v3 }
  0x95   : > { %2079 = vmatmul.mubr.msk.f32.vlgmr.msra.gmra.mrb[2].mxu1 %vm274_vm3, %v245_v60  ;;  %v781_v61 = vpop.permute.xlu0 %780 }
  0x96   : > { %2082 = vmatpush3.msk.msra.mxu1 %vm278_vm1, %v601_v57  ;;  %2083 = vmatprep.mubr.msk.f32.mxu1 %vm2207_vm0, %v2204_v3  ;;  %v786_v0 = vsel %vm784_vm5, %v781_v61, %v783_v59 }
  0x97   : > { %2086 = vmatprep.subr.mxu1 %v2204_v3  ;;  %v963_v63 = vpop.permute.xlu1 %962 }
  0x99   : > { %2006 = vmatmul.mubr.msk.f32.vlgmr.msra.gmra.mrb[0].mxu0 %vm274_vm3, %v245_v60  ;;  %v779_v2 = vpop.permute.xlu0 %778  ;;  %2084 = vmatmul.mubr.msk.f32.vlgmr.msra.gmra.mrb[4].mxu1 %vm274_vm3, %v2009_v1 }
  0x9a   : > { %2011 = vmatpush1.msk.msra.mxu0 %vm278_vm1, %v603_v62  ;;  %678 = vmatprep.mubr.f32.mxu0 %v2204_v3  ;;  %v785_v8 = vsel %vm784_vm5, %v779_v2, %v781_v61 }
  0x9b   : > { %2016 = vmatprep.subr.msk.mxu0 %vm278_vm1, %v786_v0  ;;  %2087 = vmatpush3.msk.msra.mxu1 %vm278_vm1, %v783_v59  ;;  %v961_v4 = vpop.permute.xlu1 %960 }
  0x9c   : > { %2088 = vmatprep.mubr.msk.f32.mxu1 %vm2207_vm0, %v2204_v3  ;;  %2091 = vmatprep.subr.mxu1 %v2204_v3  ;;  %v967_v15 = vsel %vm966_vm6, %v961_v4, %v963_v63 }
  0x9d   : > { %v965_v6 = vpop.permute.xlu0 %964  ;;  %2089 = vmatmul.mubr.msk.f32.vlgmr.msra.gmra.mrb[6].mxu1 %vm274_vm3, %v2015_v5 }
  0x9e   : > { %2092 = vmatpush3.msk.msra.mxu1 %vm278_vm1, %v965_v6  ;;  %2093 = vmatprep.mubr.msk.f32.mxu1 %vm2207_vm0, %v2204_v3  ;;  %v968_v10 = vsel %vm966_vm6, %v963_v63, %v965_v6 }
  0x9f   : > { %v1147_v9 = vpop.permute.xlu1 %1146  ;;  %2096 = vmatprep.subr.mxu1 %v2204_v3 }
  0xa1   : > { %2012 = vmatmul.mubr.msk.f32.vlgmr.msra.gmra.mrb[0].mxu0 %vm274_vm3, %v2009_v1  ;;  %v1145_v11 = vpop.permute.xlu0 %1144  ;;  %2094 = vmatmul.mubr.msk.f32.vlgmr.msra.gmra.mrb[8].mxu1 %vm274_vm3, %v2021_v7 }
  0xa2   : > { %2017 = vmatpush1.msk.msra.mxu0 %vm278_vm1, %v785_v8  ;;  %860 = vmatprep.mubr.f32.mxu0 %v2204_v3  ;;  %v1150_v17 = vsel %vm1148_vm7, %v1145_v11, %v1147_v9 }
  0xa3   : > { %2022 = vmatprep.subr.msk.mxu0 %vm278_vm1, %v968_v10  ;;  %v1327_v13 = vpop.permute.xlu1 %1326  ;;  %2097 = vmatpush3.msk.msra.mxu1 %vm278_vm1, %v1147_v9 }
  0xa4   : > { %2098 = vmatprep.mubr.msk.f32.mxu1 %vm2207_vm0, %v2204_v3  ;;  %2101 = vmatprep.subr.mxu1 %v2204_v3 }
  0xa5   : > { %v1143_v14 = vpop.permute.xlu0 %1142  ;;  %2099 = vmatmul.mubr.msk.f32.vlgmr.msra.gmra.mrb[10].mxu1 %vm274_vm3, %v2027_v12 }
  0xa6   : > { %2103 = vmatprep.mubr.msk.f32.mxu1 %vm2207_vm0, %v2204_v3  ;;  %v1149_v23 = vsel %vm1148_vm7, %v1143_v14, %v1145_v11 }
  0xa7   : > { %v1325_v16 = vpop.permute.xlu1 %1324 }
  0xa8   : > { %v1331_v28 = vsel %vm1330_vm8, %v1325_v16, %v1327_v13 }
  0xa9   : > { %2018 = vmatmul.mubr.msk.f32.vlgmr.msra.gmra.mrb[0].mxu0 %vm274_vm3, %v2015_v5  ;;  %v1329_v18 = vpop.permute.xlu0 %1328 }
  0xaa   : > { %2023 = vmatpush1.msk.msra.mxu0 %vm278_vm1, %v967_v15  ;;  %1042 = vmatprep.mubr.f32.mxu0 %v2204_v3  ;;  %v1332_v24 = vsel %vm1330_vm8, %v1327_v13, %v1329_v18 }
  0xab   : > { %2028 = vmatprep.subr.msk.mxu0 %vm278_vm1, %v1150_v17  ;;  %2102 = vmatpush3.msk.msra.mxu1 %vm278_vm1, %v1329_v18  ;;  %v1511_v20 = vpop.permute.xlu1 %1510 }
  0xac   : > { %2104 = vmatmul.mubr.msk.f32.vlgmr.msra.gmra.mrb[12].mxu1 %vm274_vm3, %v2033_v19  ;;  %2106 = vmatprep.subr.mxu1 %v2204_v3 }
  0xad   : > { %v1509_v21 = vpop.permute.xlu0 %1508  ;;  %2107 = vmatpush3.msk.msra.mxu1 %vm278_vm1, %v1511_v20  ;;  %2108 = vmatprep.mubr.msk.f32.mxu1 %vm2207_vm0, %v2204_v3 }
  0xae   : > { %2111 = vmatprep.subr.mxu1 %v2204_v3  ;;  %v1514_v29 = vsel %vm1512_vm9, %v1509_v21, %v1511_v20 }
  0xaf   : > { %v1691_v30 = vpop.permute.xlu1 %1690 }
  0xb0   : > { %2109 = vmatmul.mubr.msk.f32.vlgmr.msra.gmra.mrb[14].mxu1 %vm274_vm3, %v2039_v22 }
  0xb1   : > { %2024 = vmatmul.mubr.msk.f32.vlgmr.msra.gmra.mrb[0].mxu0 %vm274_vm3, %v2021_v7  ;;  %v1507_v25 = vpop.permute.xlu0 %1506  ;;  %2113 = vmatprep.mubr.msk.f32.mxu1 %vm2207_vm0, %v2204_v3 }
  0xb2   : > { %2029 = vmatpush1.msk.msra.mxu0 %vm278_vm1, %v1149_v23  ;;  %1224 = vmatprep.mubr.f32.mxu0 %v2204_v3  ;;  %v1513_v31 = vsel %vm1512_vm9, %v1507_v25, %v1509_v21 }
  0xb3   : > { %2034 = vmatprep.subr.msk.mxu0 %vm278_vm1, %v1332_v24  ;;  %v1689_v33 = vpop.permute.xlu1 %1688 }
  0xb4   : > { %v1695_v34 = vsel %vm1694_vm10, %v1689_v33, %v1691_v30 }
  0xb5   : > { %v1693_v27 = vpop.permute.xlu0 %1692 }
  0xb6   : > { %2112 = vmatpush3.msk.msra.mxu1 %vm278_vm1, %v1693_v27  ;;  %v1696_v32 = vsel %vm1694_vm10, %v1691_v30, %v1693_v27 }
  0xb7   : > { %2114 = vmatmul.mubr.msk.f32.vlgmr.msra.gmra.mrb[16].mxu1 %vm274_vm3, %v2045_v26 }
  0xb9   : > { %2030 = vmatmul.mubr.msk.f32.vlgmr.msra.gmra.mrb[0].mxu0 %vm274_vm3, %v2027_v12 }
  0xba   : > { %2035 = vmatpush1.msk.msra.mxu0 %vm278_vm1, %v1331_v28  ;;  %1406 = vmatprep.mubr.f32.mxu0 %v2204_v3 }
  0xbb   : > { %2040 = vmatprep.subr.msk.mxu0 %vm278_vm1, %v1514_v29 }
  0xc1   : > { %2036 = vmatmul.mubr.msk.f32.vlgmr.msra.gmra.mrb[0].mxu0 %vm274_vm3, %v2033_v19 }
  0xc2   : > { %2041 = vmatpush1.msk.msra.mxu0 %vm278_vm1, %v1513_v31  ;;  %1588 = vmatprep.mubr.f32.mxu0 %v2204_v3 }
  0xc3   : > { %2046 = vmatprep.subr.msk.mxu0 %vm278_vm1, %v1696_v32 }
  0xc6   : > { %v1854_v58 = vpop.permute.xlu0 %1853 }
  0xc9   : > { %2042 = vmatmul.mubr.msk.f32.vlgmr.msra.gmra.mrb[0].mxu0 %vm274_vm3, %v2039_v22 }
  0xca   : > { %2047 = vmatpush1.msk.msra.mxu0 %vm278_vm1, %v1695_v34  ;;  %1770 = vmatprep.mubr.f32.mxu0 %v2204_v3 }
  0xd1   : > { %2048 = vmatmul.mubr.msk.f32.vlgmr.msra.gmra.mrb[0].mxu0 %vm274_vm3, %v2045_v26 }
 0x162   : > { %v422_v35 = vpop.f32.mrb[0].mxu1 }
 0x163   : > { %v2075_v36 = vpop.f32.mrb[1].mxu1 }
 0x168   : > { %v572_v37 = vpop.f32.mrb[2].mxu1 }
 0x169   : > { %v573_v38 = vadd.f32 %v572_v37, %v422_v35  ;;  %v2080_v39 = vpop.f32.mrb[3].mxu1 }
 0x16c   : > { %v751_v40 = vpop.f32.mrb[4].mxu1 }
 0x16d   : > { %v757_v41 = vadd.f32 %v751_v40, %v573_v38  ;;  %v2085_v42 = vpop.f32.mrb[5].mxu1 }
 0x170   : > { %v933_v43 = vpop.f32.mrb[6].mxu1 }
 0x171   : > { %v939_v44 = vadd.f32 %v933_v43, %v757_v41  ;;  %v2090_v45 = vpop.f32.mrb[7].mxu1 }
 0x174   : > { %v1115_v46 = vpop.f32.mrb[8].mxu1 }
 0x175   : > { %v1121_v47 = vadd.f32 %v1115_v46, %v939_v44  ;;  %v2095_v48 = vpop.f32.mrb[9].mxu1 }
 0x178   : > { %v1297_v49 = vpop.f32.mrb[10].mxu1 }
 0x179   : > { %v1303_v50 = vadd.f32 %v1297_v49, %v1121_v47  ;;  %v2100_v3 = vpop.f32.mrb[11].mxu1 }
 0x17f   : > { %v1479_v51 = vpop.f32.mrb[12].mxu1 }
 0x180   : > { %v1485_v52 = vadd.f32 %v1479_v51, %v1303_v50  ;;  %v2105_v53 = vpop.f32.mrb[13].mxu1 }
 0x183   : > { %v1661_v54 = vpop.f32.mrb[14].mxu1 }
 0x184   : > { %v1667_v55 = vadd.f32 %v1661_v54, %v1485_v52  ;;  %v2110_v56 = vpop.f32.mrb[15].mxu1 }
 0x18a   : > { %v1843_v57 = vpop.f32.mrb[16].mxu1 }
 0x18b   : > { %v1849_v59 = vadd.f32 %v1843_v57, %v1667_v55  ;;  %v2115_v60 = vpop.f32.mrb[17].mxu1 }
 0x18d   : > { %v1858_v61 = vadd.f32 %v1854_v58, %v1849_v59 }
 0x18f   : > { %1865 = vst.msk [vmem:[%s243_s28 + $0x8] sm:$0x7] %vm1864_vm11, %v1858_v61 }
 0x1a4   : > { %v1772_v62 = vpop.f32.mrb[0].mxu0 }
 0x1a5   : > { %v1856_v63 = vadd.f32 %v1854_v58, %v1772_v62  ;;  %v1774_v0 = vpop.f32.mrb[1].mxu0 }
 0x1a6   : > { %v1857_v1 = vadd.f32 %v1854_v58, %v1774_v0 }
 0x1a8   : > { %v1861_v2 = vcombine.low %v1856_v63, %v1857_v1 }
 0x1aa   : > { %1863 = vst [vmem:[%s243_s28] sm:$0x77] %v1861_v2 }
 0x1ab PF: > { %s13_s14 = sadd.s32 1, %s2201_s14   ;;  %s2439_s12 = smov %s2197_s13 }
 0x1ac   : > { %p10_p5 = scmp.ge.s32.totalorder %s13_s14, 4   ;;  %s2440_s13 = smov %s2442_s15 }
 0x1ae   :  { %12 = sbr.rel (!%p10_p5) target bundleno = 2 (0x2), region = 76 }

// kernel: _lambda_.4
= control target key start
LH: loop header
LB: loop body
LE: loop exit
PB: predicated region body
PF: predicated region fallthrough
CT: control target
= control target key end

     0   :  { %s5145_s12 = smov 0   ;;  %s5147_s13 = smov 0   ;;  %s5783_s0 = inlined_call_operand.vmem [shape: f32[2,1,3,420], index: 0, kind: input, shape index: {}]   ;;  %s5784_s1 = inlined_call_operand.vmem [shape: f32[1,25,5,3], index: 1, kind: input, shape index: {}]   ;;  %s5785_s2 = inlined_call_operand.vmem [shape: f32[1,5,1], index: 2, kind: input, shape index: {}]   ;;  %s5786_s3 = inlined_call_operand.vmem [shape: f32[2,1,5,320], index: 3, kind: output, shape index: {}]  }
   0x1   :  { %s5149_s14 = smov 0  }
   0x2 LB: > { %s25_s15 = sadd.s32 1, %s5092_s13  ;;  %p4612_p0 = scmp.ge.s32.totalorder %s5096_s14, 1  ;;  %s5096_s14 = sphi %s5149_s14, %s13_s14   ;;  %s5092_s13 = sphi %s5147_s13, %s5788_s13   ;;  %s5088_s12 = sphi %s5145_s12, %s5787_s12  }
   0x3   : > { %p27_p1 = scmp.ge.s32.totalorder %s25_s15, 2  ;;  %p176_p2 = scmp.lt.s32.totalorder %s5096_s14, 3 }
   0x5   : > { %s5790_s15 = smov (%p27_p1, %s25_s15), 0  ;;  %p177_p3 = pnand %p4612_p0, %p176_p2 }
   0x6   : > { %p217_p4 = scmp.lt.s32.totalorder (!%p177_p3), %s5088_s12, 1  ;;  %v5098_v0 = vmov (!%p177_p3), 0.0   ;;  %vm5099_vm0 = vmmov (!%p177_p3), 0   ;;  %s5100_s20 = smov (!%p177_p3), 127   ;;  %vm265_vm1 = vcmask (!%p177_p3), 1042432   ;;  %vm258_vm2 = vcmask (!%p177_p3), 1039360  }
   0x7   : > { %180 = sbr.rel (%p177_p3) target bundleno = 550 (0x226), region = 32  ;;  %4818 = vmatprep.subr.mxu1 (!%p177_p3), %v5098_v0  ;;  %336 = vmatprep.mubr.f32.mxu0 (!%p177_p3), %v5098_v0  ;;  %s5101_s21 = smov (!%p177_p3), 126   ;;  %vm261_vm3 = vcmask (!%p177_p3), 23552   ;;  %vm576_vm4 = vcmask (!%p177_p3), 1031168   ;;  %vm745_vm5 = vcmask (!%p177_p3), 1022976   ;;  %vm914_vm6 = vcmask (!%p177_p3), 1014784  }
   0x8   : > { %4820 = vmatprep.mubr.msk.f32.mxu1 (!%p177_p3), %vm5099_vm0, %v5098_v0  ;;  %s5102_s22 = smov (!%p177_p3), 125   ;;  %s5103_s23 = smov (!%p177_p3), 124   ;;  %vm1083_vm7 = vcmask (!%p177_p3), 883712   ;;  %vm1252_vm8 = vcmask (!%p177_p3), 875520   ;;  %vm1421_vm9 = vcmask (!%p177_p3), 867328   ;;  %vm1590_vm10 = vcmask (!%p177_p3), 859136  }
   0x9   : > { %s5104_s24 = smov (!%p177_p3), 108   ;;  %s5105_s25 = smov (!%p177_p3), 107   ;;  %vm1759_vm11 = vcmask (!%p177_p3), 850944   ;;  %vm1928_vm12 = vcmask (!%p177_p3), 719872   ;;  %vm2097_vm13 = vcmask (!%p177_p3), 711680   ;;  %vm2266_vm14 = vcmask (!%p177_p3), 703488  }
   0xa   : > { %s5106_s26 = smov (!%p177_p3), 106   ;;  %s5107_s27 = smov (!%p177_p3), 105   ;;  %vm2435_vm15 = vcmask (!%p177_p3), 695296  }
   0xb   : > { %s5108_s28 = smov (!%p177_p3), 104   ;;  %s5109_s29 = smov (!%p177_p3), 88  }
   0xc   : > { %s5110_s30 = smov (!%p177_p3), 87   ;;  %s5111_s4 = smov (!%p177_p3), 86  }
   0xd   : > { %s5112_s5 = smov (!%p177_p3), 85   ;;  %s5113_s6 = smov (!%p177_p3), 84  }
   0xe   : > { %s5792_s12 = smov (!%p217_p4, %s5088_s12), 1  ;;  %s5114_s7 = smov 68  }
   0xf   : > { %s4767_s16 = sshll.u32 %s5792_s12, 4  ;;  %s5115_s8 = smov 67  }
  0x10   : > { %s5171_s19 = scalar_lea.vmem %s5783_s0, %s4767_s16  ;;  %s5116_s9 = smov 66  }
  0x11   : > { %v5176_v1 = vld [vmem:[%s5171_s19] sm:$0x77]  ;;  %v5186_v5 = vld [vmem:[%s5171_s19 + $0x8] sm:$0x7]  ;;  %s5117_s10 = smov 65   ;;  %s5118_s11 = smov 64  }
  0x12   : > { %v563_v2 = vld [vmem:[%s5171_s19] sm:$0x77]  ;;  %252 = vrot.lane.b32.xlu1 %v5176_v1, %s5100_s20  ;;  %v5182_v3 = vcombine.high %v5176_v1, %v5176_v1  ;;  %v564_v6 = vld [vmem:[%s5171_s19 + $0x8] sm:$0x7]  ;;  %s5119_s16 = smov 48   ;;  %s5120_s17 = smov 47  }
  0x13   : > { %v569_v4 = vcombine.high %v563_v2, %v563_v2  ;;  %v732_v7 = vld [vmem:[%s5171_s19] sm:$0x77]  ;;  %v733_v8 = vld [vmem:[%s5171_s19 + $0x8] sm:$0x7] }
  0x14   : > { %254 = vrot.lane.b32.xlu0 %v5182_v3, %s5100_s20  ;;  %v901_v9 = vld [vmem:[%s5171_s19] sm:$0x77]  ;;  %v738_v10 = vcombine.high %v732_v7, %v732_v7  ;;  %v902_v12 = vld [vmem:[%s5171_s19 + $0x8] sm:$0x7] }
  0x15   : > { %v907_v11 = vcombine.high %v901_v9, %v901_v9  ;;  %v1070_v13 = vld [vmem:[%s5171_s19] sm:$0x77]  ;;  %v1071_v14 = vld [vmem:[%s5171_s19 + $0x8] sm:$0x7] }
  0x16   : > { %572 = vrot.lane.b32.xlu1 %v569_v4, %s5101_s21  ;;  %v1239_v15 = vld [vmem:[%s5171_s19] sm:$0x77]  ;;  %v1076_v16 = vcombine.high %v1070_v13, %v1070_v13  ;;  %v1240_v18 = vld [vmem:[%s5171_s19 + $0x8] sm:$0x7] }
  0x17   : > { %v1245_v17 = vcombine.high %v1239_v15, %v1239_v15  ;;  %v1408_v19 = vld [vmem:[%s5171_s19] sm:$0x77]  ;;  %v1409_v20 = vld [vmem:[%s5171_s19 + $0x8] sm:$0x7] }
  0x18   : > { %256 = vrot.lane.b32.xlu0 %v5186_v5, %s5100_s20  ;;  %v1577_v21 = vld [vmem:[%s5171_s19] sm:$0x77]  ;;  %v1414_v22 = vcombine.high %v1408_v19, %v1408_v19  ;;  %v1578_v24 = vld [vmem:[%s5171_s19 + $0x8] sm:$0x7] }
  0x19   : > { %v1583_v23 = vcombine.high %v1577_v21, %v1577_v21  ;;  %v1746_v25 = vld [vmem:[%s5171_s19] sm:$0x77]  ;;  %v1747_v26 = vld [vmem:[%s5171_s19 + $0x8] sm:$0x7] }
  0x1a   : > { %570 = vrot.lane.b32.xlu1 %v563_v2, %s5101_s21  ;;  %v1915_v27 = vld [vmem:[%s5171_s19] sm:$0x77]  ;;  %v1752_v28 = vcombine.high %v1746_v25, %v1746_v25  ;;  %v1916_v30 = vld [vmem:[%s5171_s19 + $0x8] sm:$0x7] }
  0x1b   : > { %v1921_v29 = vcombine.high %v1915_v27, %v1915_v27  ;;  %v2084_v31 = vld [vmem:[%s5171_s19] sm:$0x77]  ;;  %v2085_v32 = vld [vmem:[%s5171_s19 + $0x8] sm:$0x7] }
  0x1c   : > { %574 = vrot.lane.b32.xlu0 %v564_v6, %s5101_s21  ;;  %v2253_v33 = vld [vmem:[%s5171_s19] sm:$0x77]  ;;  %v2090_v34 = vcombine.high %v2084_v31, %v2084_v31  ;;  %v2254_v36 = vld [vmem:[%s5171_s19 + $0x8] sm:$0x7]  ;;  %s5121_s21 = smov 46  }
  0x1d   : > { %v2259_v35 = vcombine.high %v2253_v33, %v2253_v33  ;;  %v2422_v37 = vld [vmem:[%s5171_s19] sm:$0x77]  ;;  %v2423_v38 = vld [vmem:[%s5171_s19 + $0x8] sm:$0x7] }
  0x1e   : > { %743 = vrot.lane.b32.xlu1 %v733_v8, %s5102_s22  ;;  %v2591_v39 = vld [vmem:[%s5171_s19] sm:$0x77]  ;;  %v2428_v40 = vcombine.high %v2422_v37, %v2422_v37  ;;  %v2592_v42 = vld [vmem:[%s5171_s19 + $0x8] sm:$0x7] }
  0x1f   : > { %v2597_v41 = vcombine.high %v2591_v39, %v2591_v39  ;;  %v2760_v43 = vld [vmem:[%s5171_s19] sm:$0x77]  ;;  %v2761_v44 = vld [vmem:[%s5171_s19 + $0x8] sm:$0x7] }
  0x20   : > { %741 = vrot.lane.b32.xlu0 %v738_v10, %s5102_s22  ;;  %v2929_v45 = vld [vmem:[%s5171_s19] sm:$0x77]  ;;  %v2766_v46 = vcombine.high %v2760_v43, %v2760_v43  ;;  %v2930_v48 = vld [vmem:[%s5171_s19 + $0x8] sm:$0x7] }
  0x21   : > { %v2935_v47 = vcombine.high %v2929_v45, %v2929_v45  ;;  %v3098_v49 = vld [vmem:[%s5171_s19] sm:$0x77]  ;;  %v3099_v50 = vld [vmem:[%s5171_s19 + $0x8] sm:$0x7] }
  0x22   : > { %910 = vrot.lane.b32.xlu1 %v907_v11, %s5103_s23  ;;  %v3267_v51 = vld [vmem:[%s5171_s19] sm:$0x77]  ;;  %v3104_v52 = vcombine.high %v3098_v49, %v3098_v49  ;;  %v3268_v54 = vld [vmem:[%s5171_s19 + $0x8] sm:$0x7] }
  0x23   : > { %v3273_v53 = vcombine.high %v3267_v51, %v3267_v51  ;;  %v3436_v55 = vld [vmem:[%s5171_s19] sm:$0x77]  ;;  %v3437_v56 = vld [vmem:[%s5171_s19 + $0x8] sm:$0x7] }
  0x24   : > { %739 = vrot.lane.b32.xlu0 %v732_v7, %s5102_s22  ;;  %v3605_v57 = vld [vmem:[%s5171_s19] sm:$0x77]  ;;  %v3442_v58 = vcombine.high %v3436_v55, %v3436_v55  ;;  %v3606_v61 = vld [vmem:[%s5171_s19 + $0x8] sm:$0x77] }
  0x25   : > { %v3611_v59 = vcombine.high %v3605_v57, %v3605_v57  ;;  %v3778_v62 = vld [vmem:[%s5171_s19] sm:$0x77]  ;;  %v3779_v2 = vld [vmem:[%s5171_s19 + $0x8] sm:$0x77]  ;;  %v3612_v8 = vcombine.high %v3606_v61, %v3606_v61 }
  0x26   : > { %908 = vrot.lane.b32.xlu1 %v901_v9, %s5103_s23  ;;  %v3784_v6 = vcombine.high %v3778_v62, %v3778_v62  ;;  %v4616_v10 = vld [vmem:[%s5784_s1 + $0x8] sm:$0x1f] }
  0x28   : > { %912 = vrot.lane.b32.xlu0 %v902_v12, %s5103_s23 }
  0x2a   : > { %1081 = vrot.lane.b32.xlu1 %v1071_v14, %s5104_s24 }
  0x2c   : > { %1079 = vrot.lane.b32.xlu0 %v1076_v16, %s5104_s24 }
  0x2e   : > { %1248 = vrot.lane.b32.xlu1 %v1245_v17, %s5105_s25  ;;  %v3952_v17 = vld [vmem:[%s5171_s19 + $0x8] sm:$0x77] }
  0x30   : > { %1077 = vrot.lane.b32.xlu0 %v1070_v13, %s5104_s24  ;;  %v3951_v13 = vld [vmem:[%s5171_s19] sm:$0x77] }
  0x32   : > { %1246 = vrot.lane.b32.xlu1 %v1239_v15, %s5105_s25 }
  0x34   : > { %1250 = vrot.lane.b32.xlu0 %v1240_v18, %s5105_s25  ;;  %v3957_v18 = vcombine.high %v3951_v13, %v3951_v13 }
  0x36   : > { %1419 = vrot.lane.b32.xlu1 %v1409_v20, %s5106_s26 }
  0x38   : > { %1417 = vrot.lane.b32.xlu0 %v1414_v22, %s5106_s26 }
  0x3a   : > { %1586 = vrot.lane.b32.xlu1 %v1583_v23, %s5107_s27 }
  0x3c   : > { %1415 = vrot.lane.b32.xlu0 %v1408_v19, %s5106_s26  ;;  %v246_v19 = vld [vmem:[%s5784_s1] sm:$0x1f]  ;;  %s5122_s26 = smov 45  }
  0x3e   : > { %1584 = vrot.lane.b32.xlu1 %v1577_v21, %s5107_s27  ;;  %v4124_v21 = vld [vmem:[%s5171_s19] sm:$0x77] }
  0x40   : > { %1588 = vrot.lane.b32.xlu0 %v1578_v24, %s5107_s27  ;;  %v4130_v24 = vcombine.high %v4124_v21, %v4124_v21 }
  0x42   : > { %1757 = vrot.lane.b32.xlu1 %v1747_v26, %s5108_s28 }
  0x44   : > { %1755 = vrot.lane.b32.xlu0 %v1752_v28, %s5108_s28 }
  0x46   : > { %1924 = vrot.lane.b32.xlu1 %v1921_v29, %s5109_s29 }
  0x48   : > { %1753 = vrot.lane.b32.xlu0 %v1746_v25, %s5108_s28  ;;  %v3958_v25 = vcombine.high %v3952_v17, %v3952_v17  ;;  %s4991_s28 = smul.u32 24, %s5792_s12 }
  0x4a   : > { %1922 = vrot.lane.b32.xlu1 %v1915_v27, %s5109_s29  ;;  %v4627_v27 = vld [vmem:[%s5784_s1 + $0x10] sm:$0x1f] }
  0x4c   : > { %1926 = vrot.lane.b32.xlu0 %v1916_v30, %s5109_s29 }
  0x4e   : > { %2095 = vrot.lane.b32.xlu1 %v2085_v32, %s5110_s30  ;;  %v4633_v32 = vld [vmem:[%s5784_s1 + $0x18] sm:$0x1f] }
  0x50   : > { %2093 = vrot.lane.b32.xlu0 %v2090_v34, %s5110_s30  ;;  %v4125_v34 = vld [vmem:[%s5171_s19 + $0x8] sm:$0x77] }
  0x52   : > { %2262 = vrot.lane.b32.xlu1 %v2259_v35, %s5111_s4 }
  0x54   : > { %2091 = vrot.lane.b32.xlu0 %v2084_v31, %s5110_s30  ;;  %v4297_v31 = vld [vmem:[%s5171_s19] sm:$0x77] }
  0x56   : > { %2260 = vrot.lane.b32.xlu1 %v2253_v33, %s5111_s4 }
  0x58   : > { %2264 = vrot.lane.b32.xlu0 %v2254_v36, %s5111_s4  ;;  %v4303_v36 = vcombine.high %v4297_v31, %v4297_v31  ;;  %s5123_s4 = smov 44  }
  0x5a   : > { %2433 = vrot.lane.b32.xlu1 %v2423_v38, %s5112_s5 }
  0x5c   : > { %2431 = vrot.lane.b32.xlu0 %v2428_v40, %s5112_s5  ;;  %v4639_v40 = vld [vmem:[%s5784_s1 + $0x20] sm:$0x1f] }
  0x5e   : > { %2600 = vrot.lane.b32.xlu1 %v2597_v41, %s5113_s6 }
  0x60   : > { %2429 = vrot.lane.b32.xlu0 %v2422_v37, %s5112_s5  ;;  %v4131_v37 = vcombine.high %v4125_v34, %v4125_v34 }
  0x62   : > { %2598 = vrot.lane.b32.xlu1 %v2591_v39, %s5113_s6  ;;  %v4298_v39 = vld [vmem:[%s5171_s19 + $0x8] sm:$0x77] }
  0x64   : > { %2602 = vrot.lane.b32.xlu0 %v2592_v42, %s5113_s6  ;;  %v4304_v42 = vcombine.high %v4298_v39, %v4298_v39 }
  0x66   : > { %2771 = vrot.lane.b32.xlu1 %v2761_v44, %s5114_s7 }
  0x68   : > { %2769 = vrot.lane.b32.xlu0 %v2766_v46, %s5114_s7  ;;  %v4645_v46 = vld [vmem:[%s5784_s1 + $0x28] sm:$0x1f] }
  0x6a   : > { %2938 = vrot.lane.b32.xlu1 %v2935_v47, %s5115_s8 }
  0x6c   : > { %2767 = vrot.lane.b32.xlu0 %v2760_v43, %s5114_s7 }
  0x6e   : > { %2936 = vrot.lane.b32.xlu1 %v2929_v45, %s5115_s8 }
  0x70   : > { %2940 = vrot.lane.b32.xlu0 %v2930_v48, %s5115_s8 }
  0x72   : > { %3109 = vrot.lane.b32.xlu1 %v3099_v50, %s5116_s9  ;;  %v4651_v50 = vld [vmem:[%s5784_s1 + $0x30] sm:$0x1f] }
  0x74   : > { %3107 = vrot.lane.b32.xlu0 %v3104_v52, %s5116_s9 }
  0x76   : > { %3276 = vrot.lane.b32.xlu1 %v3273_v53, %s5117_s10 }
  0x78   : > { %3105 = vrot.lane.b32.xlu0 %v3098_v49, %s5116_s9 }
  0x7a   : > { %3274 = vrot.lane.b32.xlu1 %v3267_v51, %s5117_s10 }
  0x7c   : > { %3278 = vrot.lane.b32.xlu0 %v3268_v54, %s5117_s10 }
  0x7e   : > { %3447 = vrot.lane.b32.xlu1 %v3437_v56, %s5118_s11 }
  0x80   : > { %3445 = vrot.lane.b32.xlu0 %v3442_v58, %s5118_s11  ;;  %v4663_v58 = vld [vmem:[%s5784_s1 + $0x40] sm:$0x1f] }
  0x82   : > { %3615 = vrot.lane.b32.xlu1 %v3611_v59, %s5119_s16 }
  0x84   : > { %3443 = vrot.lane.b32.xlu0 %v3436_v55, %s5118_s11  ;;  %v253_v60 = vpop.permute.xlu1 %252  ;;  %v4657_v55 = vld [vmem:[%s5784_s1 + $0x38] sm:$0x1f] }
  0x86   : > { %v255_v63 = vpop.permute.xlu0 %254  ;;  %3613 = vrot.lane.b32.xlu1 %v3605_v57, %s5119_s16 }
  0x87   : > { %v259_v11 = vsel %vm258_vm2, %v253_v60, %v255_v63 }
  0x88   : > { %3617 = vrot.lane.b32.xlu0 %v3606_v61, %s5119_s16  ;;  %v573_v4 = vpop.permute.xlu1 %572 }
  0x8a   : > { %v257_v7 = vpop.permute.xlu0 %256  ;;  %3790 = vrot.lane.b32.xlu1 %v3779_v2, %s5120_s17 }
  0x8b   : > { %4819 = vmatpush3.msk.msra.mxu1 %vm265_vm1, %v257_v7  ;;  %v260_v9 = vsel %vm258_vm2, %v255_v63, %v257_v7  ;;  %v5371_v63 = vld [vmem:[%s5784_s1 + $0x48] sm:$0x1f]  ;;  %vm2604_vm2 = vcmask 687104  }
  0x8c   : > { %3788 = vrot.lane.b32.xlu0 %v3784_v6, %s5120_s17  ;;  %4617 = vmatprep.subr.msk.mxu0 %vm265_vm1, %v260_v9  ;;  %v571_v12 = vpop.permute.xlu1 %570 }
  0x8d   : > { %4618 = vmatpush1.msk.msra.mxu0 %vm265_vm1, %v259_v11  ;;  %4821 = vmatmul.mubr.msk.f32.vlgmr.msra.gmra.mrb[0].mxu1 %vm261_vm3, %v4616_v10  ;;  %v5390_v11 = vld [vmem:[%s5784_s1 + $0x50] sm:$0x1f] }
  0x8e   : > { %4619 = vmatmul.mubr.msk.f32.vlgmr.msra.gmra.mrb[0].mxu0 %vm261_vm3, %v4616_v10  ;;  %4622 = vmatprep.subr.msk.mxu0 %vm265_vm1, %v5182_v3  ;;  %v575_v14 = vpop.permute.xlu0 %574 }
  0x8f   : > { %v578_v15 = vsel %vm576_vm4, %v573_v4, %v575_v14  ;;  %4623 = vmatpush1.msk.msra.mxu0 %vm265_vm1, %v5176_v1  ;;  %3619 = vrot.lane.b32.xlu1 %v3612_v8, %s5119_s16  ;;  %v3785_v1 = vcombine.high %v3779_v2, %v3779_v2 }
  0x90   : > { %3786 = vrot.lane.b32.xlu0 %v3778_v62, %s5120_s17  ;;  %v744_v16 = vpop.permute.xlu1 %743  ;;  %4823 = vmatprep.subr.mxu1 %v5098_v0 }
  0x91   : > { %4824 = vmatpush3.msk.msra.mxu1 %vm265_vm1, %v5186_v5  ;;  %4628 = vmatprep.subr.msk.mxu0 %vm265_vm1, %v578_v15  ;;  %v577_v5 = vsel %vm576_vm4, %v571_v12, %v573_v4  ;;  %v5407_v15 = vld [vmem:[%s5784_s1 + $0x58] sm:$0x1f]  ;;  %vm2773_vm4 = vcmask 556032  }
  0x92   : > { %v742_v3 = vpop.permute.xlu0 %741  ;;  %4825 = vmatprep.mubr.msk.f32.mxu1 %vm5099_vm0, %v5098_v0  ;;  %4828 = vmatprep.subr.mxu1 %v5098_v0 }
  0x93   : > { %3963 = vrot.lane.b32.xlu1 %v3952_v17, %s5121_s21  ;;  %486 = vmatprep.mubr.f32.mxu0 %v5098_v0  ;;  %v747_v22 = vsel %vm745_vm5, %v742_v3, %v744_v16 }
  0x94   : > { %3961 = vrot.lane.b32.xlu0 %v3957_v18, %s5121_s21  ;;  %4826 = vmatmul.mubr.msk.f32.vlgmr.msra.gmra.mrb[2].mxu1 %vm261_vm3, %v246_v19  ;;  %v911_v20 = vpop.permute.xlu1 %910 }
  0x95   : > { %4829 = vmatpush3.msk.msra.mxu1 %vm265_vm1, %v575_v14  ;;  %4830 = vmatprep.mubr.msk.f32.mxu1 %vm5099_vm0, %v5098_v0 }
  0x96   : > { %4624 = vmatmul.mubr.msk.f32.vlgmr.msra.gmra.mrb[0].mxu0 %vm261_vm3, %v246_v19  ;;  %v740_v23 = vpop.permute.xlu0 %739  ;;  %4833 = vmatprep.subr.mxu1 %v5098_v0 }
  0x97   : > { %4629 = vmatpush1.msk.msra.mxu0 %vm265_vm1, %v577_v5  ;;  %3792 = vrot.lane.b32.xlu1 %v3785_v1, %s5120_s17  ;;  %v746_v29 = vsel %vm745_vm5, %v740_v23, %v742_v3  ;;  %v5423_v3 = vld [vmem:[%s5784_s1 + $0x60] sm:$0x1f]  ;;  %vm2942_vm5 = vcmask 547840  }
  0x98   : > { %3959 = vrot.lane.b32.xlu0 %v3951_v13, %s5121_s21  ;;  %v909_v26 = vpop.permute.xlu1 %908  ;;  %4634 = vmatprep.subr.msk.mxu0 %vm265_vm1, %v747_v22  ;;  %v4470_v23 = vld [vmem:[%s5785_s2] sm:$0x1f] }
  0x99   : > { %652 = vmatprep.mubr.f32.mxu0 %v5098_v0  ;;  %4831 = vmatmul.mubr.msk.f32.vlgmr.msra.gmra.mrb[4].mxu1 %vm261_vm3, %v4627_v27  ;;  %v915_v43 = vsel %vm914_vm6, %v909_v26, %v911_v20 }
  0x9a   : > { %v913_v28 = vpop.permute.xlu0 %912  ;;  %4834 = vmatpush3.msk.msra.mxu1 %vm265_vm1, %v744_v16  ;;  %4835 = vmatprep.mubr.msk.f32.mxu1 %vm5099_vm0, %v5098_v0 }
  0x9b   : > { %4134 = vrot.lane.b32.xlu1 %v4130_v24, %s5122_s26  ;;  %4838 = vmatprep.subr.mxu1 %v5098_v0  ;;  %v916_v33 = vsel %vm914_vm6, %v911_v20, %v913_v28  ;;  %vm3621_vm6 = vcmask 392192  }
  0x9c   : > { %3965 = vrot.lane.b32.xlu0 %v3958_v25, %s5121_s21  ;;  %v1082_v30 = vpop.permute.xlu1 %1081  ;;  %v5124_v25 = vmov 0  }
  0x9d   : > { %4836 = vmatmul.mubr.msk.f32.vlgmr.msra.gmra.mrb[6].mxu1 %vm261_vm3, %v4633_v32  ;;  %5043 = vset.pattern.permute.xlu1 %v5124_v25 }
  0x9e   : > { %4630 = vmatmul.mubr.msk.f32.vlgmr.msra.gmra.mrb[0].mxu0 %vm261_vm3, %v4627_v27  ;;  %v1080_v35 = vpop.permute.xlu0 %1079  ;;  %4839 = vmatpush3.msk.msra.mxu1 %vm265_vm1, %v913_v28 }
  0x9f   : > { %4635 = vmatpush1.msk.msra.mxu0 %vm265_vm1, %v746_v29  ;;  %4132 = vrot.lane.b32.xlu1 %v4124_v21, %s5122_s26  ;;  %v1085_v45 = vsel %vm1083_vm7, %v1080_v35, %v1082_v30  ;;  %v5438_v21 = vld [vmem:[%s5784_s1 + $0x68] sm:$0x1f] }
  0xa0   : > { %4136 = vrot.lane.b32.xlu0 %v4125_v34, %s5122_s26  ;;  %v1249_v38 = vpop.permute.xlu1 %1248  ;;  %4640 = vmatprep.subr.msk.mxu0 %vm265_vm1, %v916_v33  ;;  %v5487_v34 = vld [vmem:[%s5784_s1 + $0x78] sm:$0x1f] }
  0xa1   : > { %821 = vmatprep.mubr.f32.mxu0 %v5098_v0  ;;  %4840 = vmatprep.mubr.msk.f32.mxu1 %vm5099_vm0, %v5098_v0 }
  0xa2   : > { %v1078_v41 = vpop.permute.xlu0 %1077  ;;  %4843 = vmatprep.subr.mxu1 %v5098_v0  ;;  %4841 = vmatmul.mubr.msk.f32.vlgmr.msra.gmra.mrb[8].mxu1 %vm261_vm3, %v4639_v40 }
  0xa3   : > { %4307 = vrot.lane.b32.xlu1 %v4303_v36, %s5123_s4  ;;  %4844 = vmatpush3.msk.msra.mxu1 %vm265_vm1, %v1082_v30  ;;  %v1084_v51 = vsel %vm1083_vm7, %v1078_v41, %v1080_v35  ;;  %vm3111_vm7 = vcmask 539648  }
  0xa4   : > { %4138 = vrot.lane.b32.xlu0 %v4131_v37, %s5122_s26  ;;  %v1247_v44 = vpop.permute.xlu1 %1246  ;;  %4845 = vmatprep.mubr.msk.f32.mxu1 %vm5099_vm0, %v5098_v0 }
  0xa5   : > { %4848 = vmatprep.subr.mxu1 %v5098_v0  ;;  %v1253_v59 = vsel %vm1252_vm8, %v1247_v44, %v1249_v38  ;;  %5044 = vset.pattern.permute.xlu0 %v5124_v25 }
  0xa6   : > { %4636 = vmatmul.mubr.msk.f32.vlgmr.msra.gmra.mrb[0].mxu0 %vm261_vm3, %v4633_v32  ;;  %v1251_v47 = vpop.permute.xlu0 %1250  ;;  %4846 = vmatmul.mubr.msk.f32.vlgmr.msra.gmra.mrb[10].mxu1 %vm261_vm3, %v4645_v46 }
  0xa7   : > { %4641 = vmatpush1.msk.msra.mxu0 %vm265_vm1, %v915_v43  ;;  %4311 = vrot.lane.b32.xlu1 %v4304_v42, %s5123_s4  ;;  %v1254_v53 = vsel %vm1252_vm8, %v1249_v38, %v1251_v47  ;;  %vm3794_vm8 = vcmask 384000  }
  0xa8   : > { %4309 = vrot.lane.b32.xlu0 %v4298_v39, %s5123_s4  ;;  %v1420_v48 = vpop.permute.xlu1 %1419  ;;  %4646 = vmatprep.subr.msk.mxu0 %vm265_vm1, %v1085_v45  ;;  %v5530_v45 = vld [vmem:[%s5784_s1 + $0x88] sm:$0x1f] }
  0xa9   : > { %990 = vmatprep.mubr.f32.mxu0 %v5098_v0  ;;  %4849 = vmatpush3.msk.msra.mxu1 %vm265_vm1, %v1251_v47 }
  0xaa   : > { %v1418_v49 = vpop.permute.xlu0 %1417  ;;  %4850 = vmatprep.mubr.msk.f32.mxu1 %vm5099_vm0, %v5098_v0  ;;  %4853 = vmatprep.subr.mxu1 %v5098_v0 }
  0xab   : > { %4851 = vmatmul.mubr.msk.f32.vlgmr.msra.gmra.mrb[12].mxu1 %vm261_vm3, %v4651_v50  ;;  %v1423_v61 = vsel %vm1421_vm9, %v1418_v49, %v1420_v48  ;;  %4473 = vperm.xlu1 %5043, %v4470_v23  }
  0xac   : > { %v1587_v52 = vpop.permute.xlu1 %1586  ;;  %4854 = vmatpush3.msk.msra.mxu1 %vm265_vm1, %v1420_v48  ;;  %4855 = vmatprep.mubr.msk.f32.mxu1 %vm5099_vm0, %v5098_v0 }
  0xad   : > { %4858 = vmatprep.subr.mxu1 %v5098_v0  ;;  %4305 = vrot.lane.b32.xlu0 %v4297_v31, %s5123_s4  ;;  %v5467_v31 = vld [vmem:[%s5784_s1 + $0x70] sm:$0x1f]  ;;  %s243_s4 = scalar_lea.vmem %s5786_s3, %s4991_s28 }
  0xae   : > { %4642 = vmatmul.mubr.msk.f32.vlgmr.msra.gmra.mrb[0].mxu0 %vm261_vm3, %v4639_v40  ;;  %v1416_v54 = vpop.permute.xlu0 %1415  ;;  %v5510_v40 = vld [vmem:[%s5784_s1 + $0x80] sm:$0x1f] }
  0xaf   : > { %4647 = vmatpush1.msk.msra.mxu0 %vm265_vm1, %v1084_v51  ;;  %1159 = vmatprep.mubr.f32.mxu0 %v5098_v0  ;;  %v1422_v6 = vsel %vm1421_vm9, %v1416_v54, %v1418_v49  ;;  %vm3280_vm9 = vcmask 531456  }
  0xb0   : > { %v1585_v56 = vpop.permute.xlu1 %1584  ;;  %4652 = vmatprep.subr.msk.mxu0 %vm265_vm1, %v1254_v53  ;;  %4856 = vmatmul.mubr.msk.f32.vlgmr.msra.gmra.mrb[14].mxu1 %vm261_vm3, %v4657_v55  ;;  %v5561_v53 = vld [vmem:[%s5784_s1 + $0x90] sm:$0x1f] }
  0xb1   : > { %4860 = vmatprep.mubr.msk.f32.mxu1 %vm5099_vm0, %v5098_v0  ;;  %v1591_v13 = vsel %vm1590_vm10, %v1585_v56, %v1587_v52  ;;  %v5582_v56 = vld [vmem:[%s5784_s1 + $0x98] sm:$0x1f] }
  0xb2   : > { %v1589_v57 = vpop.permute.xlu0 %1588 }
  0xb3   : > { %4859 = vmatpush3.msk.msra.mxu1 %vm265_vm1, %v1589_v57  ;;  %v1592_v8 = vsel %vm1590_vm10, %v1587_v52, %v1589_v57  ;;  %vm3967_vm10 = vcmask 375808  }
  0xb4   : > { %v1758_v60 = vpop.permute.xlu1 %1757  ;;  %4863 = vmatprep.subr.mxu1 %v5098_v0  ;;  %4861 = vmatmul.mubr.msk.f32.vlgmr.msra.gmra.mrb[16].mxu1 %vm261_vm3, %v4663_v58 }
  0xb5   : > { %4864 = vmatpush3.msk.msra.mxu1 %vm265_vm1, %v1758_v60  ;;  %4865 = vmatprep.mubr.msk.f32.mxu1 %vm5099_vm0, %v5098_v0 }
  0xb6   : > { %4648 = vmatmul.mubr.msk.f32.vlgmr.msra.gmra.mrb[0].mxu0 %vm261_vm3, %v4645_v46  ;;  %v1756_v62 = vpop.permute.xlu0 %1755  ;;  %4868 = vmatprep.subr.mxu1 %v5098_v0 }
  0xb7   : > { %4653 = vmatpush1.msk.msra.mxu0 %vm265_vm1, %v1253_v59  ;;  %1328 = vmatprep.mubr.f32.mxu0 %v5098_v0  ;;  %v1761_v16 = vsel %vm1759_vm11, %v1756_v62, %v1758_v60 }
  0xb8   : > { %v5373_v2 = vpop.permute.xlu1 %1924  ;;  %4658 = vmatprep.subr.msk.mxu0 %vm265_vm1, %v1423_v61  ;;  %4866 = vmatmul.mubr.msk.f32.vlgmr.msra.gmra.mrb[18].mxu1 %vm261_vm3, %v5371_v63 }
  0xb9   : > { %4870 = vmatprep.mubr.msk.f32.mxu1 %vm5099_vm0, %v5098_v0 }
  0xba   : > { %v1754_v4 = vpop.permute.xlu0 %1753 }
  0xbb   : > { %v1760_v19 = vsel %vm1759_vm11, %v1754_v4, %v1756_v62  ;;  %vm3449_vm11 = vcmask 523264  }
  0xbc   : > { %v1923_v7 = vpop.permute.xlu1 %1922 }
  0xbd   : > { %v1929_v27 = vsel %vm1928_vm12, %v1923_v7, %v5373_v2 }
  0xbe   : > { %4654 = vmatmul.mubr.msk.f32.vlgmr.msra.gmra.mrb[0].mxu0 %vm261_vm3, %v4651_v50  ;;  %v1927_v9 = vpop.permute.xlu0 %1926 }
  0xbf   : > { %4659 = vmatpush1.msk.msra.mxu0 %vm265_vm1, %v1422_v6  ;;  %1497 = vmatprep.mubr.f32.mxu0 %v5098_v0  ;;  %v1930_v20 = vsel %vm1928_vm12, %v5373_v2, %v1927_v9  ;;  %vm4140_vm12 = vcmask 367616  }
  0xc0   : > { %v2096_v10 = vpop.permute.xlu1 %2095  ;;  %4664 = vmatprep.subr.msk.mxu0 %vm265_vm1, %v1592_v8  ;;  %4869 = vmatpush3.msk.msra.mxu1 %vm265_vm1, %v1927_v9  ;;  %v5624_v8 = vld [vmem:[%s5784_s1 + $0xa0] sm:$0x1f] }
  0xc1   : > { %4873 = vmatprep.subr.mxu1 %v5098_v0  ;;  %4871 = vmatmul.mubr.msk.f32.vlgmr.msra.gmra.mrb[20].mxu1 %vm261_vm3, %v5390_v11 }
  0xc2   : > { %v5395_v12 = vpop.permute.xlu0 %2093  ;;  %4874 = vmatpush3.msk.msra.mxu1 %vm265_vm1, %v2096_v10  ;;  %4875 = vmatprep.mubr.msk.f32.mxu1 %vm5099_vm0, %v5098_v0 }
  0xc3   : > { %4878 = vmatprep.subr.mxu1 %v5098_v0  ;;  %v2099_v29 = vsel %vm2097_vm13, %v5395_v12, %v2096_v10 }
  0xc4   : > { %v5402_v14 = vpop.permute.xlu1 %2262 }
  0xc5   : > { %4876 = vmatmul.mubr.msk.f32.vlgmr.msra.gmra.mrb[22].mxu1 %vm261_vm3, %v5407_v15 }
  0xc6   : > { %4660 = vmatmul.mubr.msk.f32.vlgmr.msra.gmra.mrb[0].mxu0 %vm261_vm3, %v4657_v55  ;;  %v2092_v17 = vpop.permute.xlu0 %2091  ;;  %4880 = vmatprep.mubr.msk.f32.mxu1 %vm5099_vm0, %v5098_v0 }
  0xc7   : > { %4665 = vmatpush1.msk.msra.mxu0 %vm265_vm1, %v1591_v13  ;;  %1666 = vmatprep.mubr.f32.mxu0 %v5098_v0  ;;  %v2098_v35 = vsel %vm2097_vm13, %v2092_v17, %v5395_v12  ;;  %vm4313_vm13 = vcmask 359424  }
  0xc8   : > { %v5417_v18 = vpop.permute.xlu1 %2260  ;;  %4670 = vmatprep.subr.msk.mxu0 %vm265_vm1, %v1761_v16  ;;  %v5654_v16 = vld [vmem:[%s5784_s1 + $0xa8] sm:$0x1f] }
  0xc9   : > { %v2267_v42 = vsel %vm2266_vm14, %v5417_v18, %v5402_v14 }
  0xca   : > { %v2265_v1 = vpop.permute.xlu0 %2264 }
  0xcb   : > { %4879 = vmatpush3.msk.msra.mxu1 %vm265_vm1, %v2265_v1  ;;  %v2268_v37 = vsel %vm2266_vm14, %v5402_v14, %v2265_v1 }
  0xcc   : > { %v2434_v5 = vpop.permute.xlu1 %2433  ;;  %4883 = vmatprep.subr.mxu1 %v5098_v0  ;;  %4881 = vmatmul.mubr.msk.f32.vlgmr.msra.gmra.mrb[24].mxu1 %vm261_vm3, %v5423_v3 }
  0xcd   : > { %4884 = vmatpush3.msk.msra.mxu1 %vm265_vm1, %v2434_v5  ;;  %4885 = vmatprep.mubr.msk.f32.mxu1 %vm5099_vm0, %v5098_v0 }
  0xce   : > { %4666 = vmatmul.mubr.msk.f32.vlgmr.msra.gmra.mrb[0].mxu0 %vm261_vm3, %v4663_v58  ;;  %v5441_v22 = vpop.permute.xlu0 %2431  ;;  %4888 = vmatprep.subr.mxu1 %v5098_v0 }
  0xcf   : > { %4671 = vmatpush1.msk.msra.mxu0 %vm265_vm1, %v1760_v19  ;;  %1835 = vmatprep.mubr.f32.mxu0 %v5098_v0  ;;  %v2437_v44 = vsel %vm2435_vm15, %v5441_v22, %v2434_v5 }
  0xd0   : > { %v5449_v24 = vpop.permute.xlu1 %2600  ;;  %4676 = vmatprep.subr.msk.mxu0 %vm265_vm1, %v1930_v20  ;;  %4886 = vmatmul.mubr.msk.f32.vlgmr.msra.gmra.mrb[26].mxu1 %vm261_vm3, %v5438_v21  ;;  %v4747_v20 = vld [vmem:[%s5784_s1 + $0xb0] sm:$0x1f] }
  0xd1   : > { %4890 = vmatprep.mubr.msk.f32.mxu1 %vm5099_vm0, %v5098_v0 }
  0xd2   : > { %v2430_v26 = vpop.permute.xlu0 %2429 }
  0xd3   : > { %v2436_v49 = vsel %vm2435_vm15, %v2430_v26, %v5441_v22 }
  0xd4   : > { %v5458_v28 = vpop.permute.xlu1 %2598 }
  0xd5   : > { %v2605_v57 = vsel %vm2604_vm2, %v5458_v28, %v5449_v24  ;;  %v4753_v28 = vld [vmem:[%s5784_s1 + $0xb8] sm:$0x1f] }
  0xd6   : > { %4672 = vmatmul.mubr.msk.f32.vlgmr.msra.gmra.mrb[0].mxu0 %vm261_vm3, %v5371_v63  ;;  %v2603_v30 = vpop.permute.xlu0 %2602 }
  0xd7   : > { %4677 = vmatpush1.msk.msra.mxu0 %vm265_vm1, %v1929_v27  ;;  %2004 = vmatprep.mubr.f32.mxu0 %v5098_v0  ;;  %v2606_v51 = vsel %vm2604_vm2, %v5449_v24, %v2603_v30 }
  0xd8   : > { %v5471_v32 = vpop.permute.xlu1 %2771  ;;  %4682 = vmatprep.subr.msk.mxu0 %vm265_vm1, %v2099_v29  ;;  %4889 = vmatpush3.msk.msra.mxu1 %vm265_vm1, %v2603_v30 }
  0xd9   : > { %4891 = vmatmul.mubr.msk.f32.vlgmr.msra.gmra.mrb[28].mxu1 %vm261_vm3, %v5467_v31  ;;  %4893 = vmatprep.subr.mxu1 %v5098_v0 }
  0xda   : > { %v5478_v33 = vpop.permute.xlu0 %2769  ;;  %4894 = vmatpush3.msk.msra.mxu1 %vm265_vm1, %v5471_v32  ;;  %4895 = vmatprep.mubr.msk.f32.mxu1 %vm5099_vm0, %v5098_v0 }
  0xdb   : > { %4898 = vmatprep.subr.mxu1 %v5098_v0  ;;  %v2775_v59 = vsel %vm2773_vm4, %v5478_v33, %v5471_v32  ;;  %v4759_v32 = vld [vmem:[%s5784_s1 + $0xc0] sm:$0x1f] }
  0xdc   : > { %v5492_v36 = vpop.permute.xlu1 %2938 }
  0xdd   : > { %4896 = vmatmul.mubr.msk.f32.vlgmr.msra.gmra.mrb[30].mxu1 %vm261_vm3, %v5487_v34 }
  0xde   : > { %4678 = vmatmul.mubr.msk.f32.vlgmr.msra.gmra.mrb[0].mxu0 %vm261_vm3, %v5390_v11  ;;  %v2768_v38 = vpop.permute.xlu0 %2767  ;;  %4900 = vmatprep.mubr.msk.f32.mxu1 %vm5099_vm0, %v5098_v0 }
  0xdf   : > { %4683 = vmatpush1.msk.msra.mxu0 %vm265_vm1, %v2098_v35  ;;  %2173 = vmatprep.mubr.f32.mxu0 %v5098_v0  ;;  %v2774_v63 = vsel %vm2773_vm4, %v2768_v38, %v5478_v33 }
  0xe0   : > { %v5504_v39 = vpop.permute.xlu1 %2936  ;;  %4688 = vmatprep.subr.msk.mxu0 %vm265_vm1, %v2268_v37 }
  0xe1   : > { %v2943_v11 = vsel %vm2942_vm5, %v5504_v39, %v5492_v36 }
  0xe2   : > { %v2941_v41 = vpop.permute.xlu0 %2940 }
  0xe3   : > { %4899 = vmatpush3.msk.msra.mxu1 %vm265_vm1, %v2941_v41  ;;  %v2944_v4 = vsel %vm2942_vm5, %v5492_v36, %v2941_v41 }
  0xe4   : > { %v5516_v43 = vpop.permute.xlu1 %3109  ;;  %4901 = vmatmul.mubr.msk.f32.vlgmr.msra.gmra.mrb[32].mxu1 %vm261_vm3, %v5510_v40  ;;  %4903 = vmatprep.subr.mxu1 %v5098_v0 }
  0xe5   : > { %4904 = vmatpush3.msk.msra.mxu1 %vm265_vm1, %v5516_v43  ;;  %4905 = vmatprep.mubr.msk.f32.mxu1 %vm5099_vm0, %v5098_v0 }
  0xe6   : > { %4684 = vmatmul.mubr.msk.f32.vlgmr.msra.gmra.mrb[0].mxu0 %vm261_vm3, %v5407_v15  ;;  %v5534_v46 = vpop.permute.xlu0 %3107  ;;  %4908 = vmatprep.subr.mxu1 %v5098_v0 }
  0xe7   : > { %4689 = vmatpush1.msk.msra.mxu0 %vm265_vm1, %v2267_v42  ;;  %2342 = vmatprep.mubr.f32.mxu0 %v5098_v0  ;;  %v3113_v12 = vsel %vm3111_vm7, %v5534_v46, %v5516_v43 }
  0xe8   : > { %v5539_v47 = vpop.permute.xlu1 %3276  ;;  %4694 = vmatprep.subr.msk.mxu0 %vm265_vm1, %v2437_v44  ;;  %4906 = vmatmul.mubr.msk.f32.vlgmr.msra.gmra.mrb[34].mxu1 %vm261_vm3, %v5530_v45 }
  0xe9   : > { %4910 = vmatprep.mubr.msk.f32.mxu1 %vm5099_vm0, %v5098_v0 }
  0xea   : > { %v5546_v48 = vpop.permute.xlu0 %3105 }
  0xec   : > { %v5550_v50 = vpop.permute.xlu1 %3274 }
  0xed   : > { %v3281_v24 = vsel %vm3280_vm9, %v5550_v50, %v5539_v47 }
  0xee   : > { %4690 = vmatmul.mubr.msk.f32.vlgmr.msra.gmra.mrb[0].mxu0 %vm261_vm3, %v5423_v3  ;;  %v5556_v52 = vpop.permute.xlu0 %3278  ;;  %v3112_v3 = vsel %vm3111_vm7, %v5546_v48, %v5534_v46 }
  0xef   : > { %4695 = vmatpush1.msk.msra.mxu0 %vm265_vm1, %v2436_v49  ;;  %2511 = vmatprep.mubr.f32.mxu0 %v5098_v0  ;;  %v3282_v1 = vsel %vm3280_vm9, %v5539_v47, %v5556_v52 }
  0xf0   : > { %v5565_v54 = vpop.permute.xlu1 %3447  ;;  %4700 = vmatprep.subr.msk.mxu0 %vm265_vm1, %v2606_v51  ;;  %4909 = vmatpush3.msk.msra.mxu1 %vm265_vm1, %v5556_v52 }
  0xf1   : > { %4911 = vmatmul.mubr.msk.f32.vlgmr.msra.gmra.mrb[36].mxu1 %vm261_vm3, %v5561_v53  ;;  %4913 = vmatprep.subr.mxu1 %v5098_v0 }
  0xf2   : > { %v5573_v55 = vpop.permute.xlu0 %3445  ;;  %4914 = vmatpush3.msk.msra.mxu1 %vm265_vm1, %v5565_v54  ;;  %4915 = vmatprep.mubr.msk.f32.mxu1 %vm5099_vm0, %v5098_v0 }
  0xf3   : > { %4918 = vmatprep.subr.mxu1 %v5098_v0  ;;  %v3451_v25 = vsel %vm3449_vm11, %v5573_v55, %v5565_v54 }
  0xf4   : > { %v5588_v58 = vpop.permute.xlu1 %3615 }
  0xf5   : > { %4916 = vmatmul.mubr.msk.f32.vlgmr.msra.gmra.mrb[38].mxu1 %vm261_vm3, %v5582_v56 }
  0xf6   : > { %4696 = vmatmul.mubr.msk.f32.vlgmr.msra.gmra.mrb[0].mxu0 %vm261_vm3, %v5438_v21  ;;  %v5597_v60 = vpop.permute.xlu0 %3443  ;;  %4920 = vmatprep.mubr.msk.f32.mxu1 %vm5099_vm0, %v5098_v0 }
  0xf7   : > { %4701 = vmatpush1.msk.msra.mxu0 %vm265_vm1, %v2605_v57  ;;  %2680 = vmatprep.mubr.f32.mxu0 %v5098_v0 }
  0xf8   : > { %v5603_v61 = vpop.permute.xlu1 %3613  ;;  %4706 = vmatprep.subr.msk.mxu0 %vm265_vm1, %v2775_v59 }
  0xf9   : > { %v3622_v36 = vsel %vm3621_vm6, %v5603_v61, %v5588_v58 }
  0xfa   : > { %v5606_v62 = vpop.permute.xlu0 %3617 }
  0xfb   : > { %v3623_v35 = vsel %vm3621_vm6, %v5588_v58, %v5606_v62 }
  0xfc   : > { %v5610_v2 = vpop.permute.xlu1 %3790 }
  0xfe   : > { %4702 = vmatmul.mubr.msk.f32.vlgmr.msra.gmra.mrb[0].mxu0 %vm261_vm3, %v5467_v31  ;;  %v5616_v6 = vpop.permute.xlu0 %3788 }
  0xff   : > { %4707 = vmatpush1.msk.msra.mxu0 %vm265_vm1, %v2774_v63  ;;  %2849 = vmatprep.mubr.f32.mxu0 %v5098_v0  ;;  %v3796_v37 = vsel %vm3794_vm8, %v5616_v6, %v5610_v2 }
 0x100   : > { %4712 = vmatprep.subr.msk.mxu0 %vm265_vm1, %v2944_v4 }
 0x101   : > { %v3620_v7 = vpop.permute.xlu1 %3619 }
 0x102   : > { %v3624_v9 = vsel %vm3621_vm6, %v5606_v62, %v3620_v7  ;;  %v5628_v10 = vpop.permute.xlu0 %3786 }
 0x103   : > { %4919 = vmatpush3.msk.msra.mxu1 %vm265_vm1, %v3624_v9  ;;  %v3795_v38 = vsel %vm3794_vm8, %v5628_v10, %v5616_v6 }
 0x104   : > { %4921 = vmatmul.mubr.msk.f32.vlgmr.msra.gmra.mrb[40].mxu1 %vm261_vm3, %v5624_v8  ;;  %4923 = vmatprep.subr.mxu1 %v5098_v0 }
 0x105   : > { %v5640_v13 = vpop.permute.xlu1 %3963  ;;  %4925 = vmatprep.mubr.msk.f32.mxu1 %vm5099_vm0, %v5098_v0 }
 0x106   : > { %4708 = vmatmul.mubr.msk.f32.vlgmr.msra.gmra.mrb[0].mxu0 %vm261_vm3, %v5487_v34  ;;  %v5646_v14 = vpop.permute.xlu0 %3961  ;;  %v3450_v34 = vsel %vm3449_vm11, %v5597_v60, %v5573_v55 }
 0x107   : > { %4713 = vmatpush1.msk.msra.mxu0 %vm265_vm1, %v2943_v11  ;;  %3018 = vmatprep.mubr.f32.mxu0 %v5098_v0  ;;  %v3969_v39 = vsel %vm3967_vm10, %v5646_v14, %v5640_v13 }
 0x108   : > { %4718 = vmatprep.subr.msk.mxu0 %vm265_vm1, %v3113_v12 }
 0x109   : > { %v3793_v15 = vpop.permute.xlu1 %3792 }
 0x10a   : > { %v3797_v17 = vsel %vm3794_vm8, %v5610_v2, %v3793_v15  ;;  %v5658_v18 = vpop.permute.xlu0 %3959 }
 0x10b   : > { %4924 = vmatpush3.msk.msra.mxu1 %vm265_vm1, %v3797_v17 }
 0x10c   : > { %4926 = vmatmul.mubr.msk.f32.vlgmr.msra.gmra.mrb[42].mxu1 %vm261_vm3, %v5654_v16  ;;  %4928 = vmatprep.subr.mxu1 %v5098_v0 }
 0x10d   : > { %v5670_v19 = vpop.permute.xlu1 %4134  ;;  %4930 = vmatprep.mubr.msk.f32.mxu1 %vm5099_vm0, %v5098_v0 }
 0x10e   : > { %4714 = vmatmul.mubr.msk.f32.vlgmr.msra.gmra.mrb[0].mxu0 %vm261_vm3, %v5510_v40  ;;  %v3966_v5 = vpop.permute.xlu0 %3965  ;;  %v3968_v40 = vsel %vm3967_vm10, %v5658_v18, %v5646_v14 }
 0x10f   : > { %4719 = vmatpush1.msk.msra.mxu0 %vm265_vm1, %v3112_v3  ;;  %v3970_v21 = vsel %vm3967_vm10, %v5640_v13, %v3966_v5  ;;  %3187 = vmatprep.mubr.f32.mxu0 %v5098_v0 }
 0x110   : > { %4724 = vmatprep.subr.msk.mxu0 %vm265_vm1, %v3282_v1  ;;  %4929 = vmatpush3.msk.msra.mxu1 %vm265_vm1, %v3970_v21 }
 0x111   : > { %v4133_v22 = vpop.permute.xlu1 %4132  ;;  %4931 = vmatmul.mubr.msk.f32.vlgmr.msra.gmra.mrb[44].mxu1 %vm261_vm3, %v4747_v20  ;;  %4933 = vmatprep.subr.mxu1 %v5098_v0 }
 0x112   : > { %v4137_v23 = vpop.permute.xlu0 %4136  ;;  %4935 = vmatprep.mubr.msk.f32.mxu1 %vm5099_vm0, %v5098_v0  ;;  %v4141_v42 = vsel %vm4140_vm12, %v4133_v22, %v5670_v19 }
 0x113   : > { %v4142_v41 = vsel %vm4140_vm12, %v5670_v19, %v4137_v23 }
 0x115   : > { %v4308_v26 = vpop.permute.xlu1 %4307 }
 0x116   : > { %4720 = vmatmul.mubr.msk.f32.vlgmr.msra.gmra.mrb[0].mxu0 %vm261_vm3, %v5530_v45  ;;  %v4139_v27 = vpop.permute.xlu0 %4138 }
 0x117   : > { %4725 = vmatpush1.msk.msra.mxu0 %vm265_vm1, %v3281_v24  ;;  %v4143_v29 = vsel %vm4140_vm12, %v4137_v23, %v4139_v27  ;;  %3356 = vmatprep.mubr.f32.mxu0 %v5098_v0 }
 0x118   : > { %4934 = vmatpush3.msk.msra.mxu1 %vm265_vm1, %v4143_v29  ;;  %4730 = vmatprep.subr.msk.mxu0 %vm265_vm1, %v3451_v25 }
 0x119   : > { %4936 = vmatmul.mubr.msk.f32.vlgmr.msra.gmra.mrb[46].mxu1 %vm261_vm3, %v4753_v28  ;;  %v4312_v30 = vpop.permute.xlu1 %4311  ;;  %4938 = vmatprep.subr.mxu1 %v5098_v0 }
 0x11a   : > { %v4310_v31 = vpop.permute.xlu0 %4309  ;;  %4940 = vmatprep.mubr.msk.f32.mxu1 %vm5099_vm0, %v5098_v0  ;;  %vm4481_vm0 = vcmask 520192  }
 0x11b   : > { %v4316_v33 = vsel %vm4313_vm13, %v4310_v31, %v4312_v30  ;;  %v4315_v43 = vsel %vm4313_vm13, %v4308_v26, %v4310_v31 }
 0x11c   : > { %4939 = vmatpush3.msk.msra.mxu1 %vm265_vm1, %v4316_v33 }
 0x11d   : > { %4941 = vmatmul.mubr.msk.f32.vlgmr.msra.gmra.mrb[48].mxu1 %vm261_vm3, %v4759_v32 }
 0x11e   : > { %4726 = vmatmul.mubr.msk.f32.vlgmr.msra.gmra.mrb[0].mxu0 %vm261_vm3, %v5561_v53 }
 0x11f   : > { %4731 = vmatpush1.msk.msra.mxu0 %vm265_vm1, %v3450_v34  ;;  %3525 = vmatprep.mubr.f32.mxu0 %v5098_v0  ;;  %v4306_v44 = vpop.permute.xlu0 %4305 }
 0x120   : > { %4736 = vmatprep.subr.msk.mxu0 %vm265_vm1, %v3623_v35  ;;  %v4314_v45 = vsel %vm4313_vm13, %v4306_v44, %v4308_v26 }
 0x126   : > { %4732 = vmatmul.mubr.msk.f32.vlgmr.msra.gmra.mrb[0].mxu0 %vm261_vm3, %v5582_v56 }
 0x127   : > { %4737 = vmatpush1.msk.msra.mxu0 %vm265_vm1, %v3622_v36  ;;  %3698 = vmatprep.mubr.f32.mxu0 %v5098_v0 }
 0x128   : > { %4742 = vmatprep.subr.msk.mxu0 %vm265_vm1, %v3796_v37 }
 0x12e   : > { %4738 = vmatmul.mubr.msk.f32.vlgmr.msra.gmra.mrb[0].mxu0 %vm261_vm3, %v5624_v8 }
 0x12f   : > { %4743 = vmatpush1.msk.msra.mxu0 %vm265_vm1, %v3795_v38  ;;  %3871 = vmatprep.mubr.f32.mxu0 %v5098_v0 }
 0x130   : > { %4748 = vmatprep.subr.msk.mxu0 %vm265_vm1, %v3969_v39 }
 0x136   : > { %4744 = vmatmul.mubr.msk.f32.vlgmr.msra.gmra.mrb[0].mxu0 %vm261_vm3, %v5654_v16 }
 0x137   : > { %4749 = vmatpush1.msk.msra.mxu0 %vm265_vm1, %v3968_v40  ;;  %4044 = vmatprep.mubr.f32.mxu0 %v5098_v0 }
 0x138   : > { %4754 = vmatprep.subr.msk.mxu0 %vm265_vm1, %v4142_v41 }
 0x13e   : > { %4750 = vmatmul.mubr.msk.f32.vlgmr.msra.gmra.mrb[0].mxu0 %vm261_vm3, %v4747_v20 }
 0x13f   : > { %4755 = vmatpush1.msk.msra.mxu0 %vm265_vm1, %v4141_v42  ;;  %4217 = vmatprep.mubr.f32.mxu0 %v5098_v0 }
 0x140   : > { %4760 = vmatprep.subr.msk.mxu0 %vm265_vm1, %v4315_v43 }
 0x146   : > { %4756 = vmatmul.mubr.msk.f32.vlgmr.msra.gmra.mrb[0].mxu0 %vm261_vm3, %v4753_v28 }
 0x147   : > { %4761 = vmatpush1.msk.msra.mxu0 %vm265_vm1, %v4314_v45  ;;  %4390 = vmatprep.mubr.f32.mxu0 %v5098_v0 }
 0x14e   : > { %4762 = vmatmul.mubr.msk.f32.vlgmr.msra.gmra.mrb[0].mxu0 %vm261_vm3, %v4759_v32 }
 0x160   : > { %v409_v46 = vpop.f32.mrb[0].mxu1 }
 0x161   : > { %v4822_v47 = vpop.f32.mrb[1].mxu1 }
 0x167   : > { %v559_v48 = vpop.f32.mrb[2].mxu1 }
 0x168   : > { %v560_v49 = vadd.f32 %v559_v48, %v409_v46  ;;  %v4827_v50 = vpop.f32.mrb[3].mxu1 }
 0x16c   : > { %v725_v51 = vpop.f32.mrb[4].mxu1 }
 0x16d   : > { %v731_v52 = vadd.f32 %v725_v51, %v560_v49  ;;  %v4832_v53 = vpop.f32.mrb[5].mxu1 }
 0x170   : > { %v894_v54 = vpop.f32.mrb[6].mxu1 }
 0x171   : > { %v900_v55 = vadd.f32 %v894_v54, %v731_v52  ;;  %v4837_v56 = vpop.f32.mrb[7].mxu1  ;;  %v4474_v54 = vpop.permute.xlu1 %4473 }
 0x175   : > { %v1063_v57 = vpop.f32.mrb[8].mxu1 }
 0x176   : > { %v1069_v58 = vadd.f32 %v1063_v57, %v900_v55  ;;  %v4842_v59 = vpop.f32.mrb[9].mxu1 }
 0x179   : > { %v1232_v60 = vpop.f32.mrb[10].mxu1 }
 0x17a   : > { %v1238_v61 = vadd.f32 %v1232_v60, %v1069_v58  ;;  %v4847_v62 = vpop.f32.mrb[11].mxu1 }
 0x17e   : > { %v1401_v0 = vpop.f32.mrb[12].mxu1 }
 0x17f   : > { %v1407_v63 = vadd.f32 %v1401_v0, %v1238_v61  ;;  %v4852_v2 = vpop.f32.mrb[13].mxu1 }
 0x183   : > { %v1570_v4 = vpop.f32.mrb[14].mxu1 }
 0x184   : > { %v1576_v6 = vadd.f32 %v1570_v4, %v1407_v63  ;;  %v4857_v7 = vpop.f32.mrb[15].mxu1 }
 0x187   : > { %v1739_v8 = vpop.f32.mrb[16].mxu1 }
 0x188   : > { %v1745_v9 = vadd.f32 %v1739_v8, %v1576_v6  ;;  %v4862_v10 = vpop.f32.mrb[17].mxu1 }
 0x18b   : > { %v1908_v11 = vpop.f32.mrb[18].mxu1 }
 0x18c   : > { %v1914_v12 = vadd.f32 %v1908_v11, %v1745_v9  ;;  %v4867_v13 = vpop.f32.mrb[19].mxu1 }
 0x194   : > { %v2077_v14 = vpop.f32.mrb[20].mxu1 }
 0x195   : > { %v2083_v15 = vadd.f32 %v2077_v14, %v1914_v12  ;;  %v4872_v16 = vpop.f32.mrb[21].mxu1 }
 0x198   : > { %v2246_v17 = vpop.f32.mrb[22].mxu1 }
 0x199   : > { %v2252_v18 = vadd.f32 %v2246_v17, %v2083_v15  ;;  %v4877_v3 = vpop.f32.mrb[23].mxu1 }
 0x19f   : > { %v2415_v1 = vpop.f32.mrb[24].mxu1 }
 0x1a0   : > { %v2421_v19 = vadd.f32 %v2415_v1, %v2252_v18  ;;  %v4882_v5 = vpop.f32.mrb[25].mxu1 }
 0x1a3   : > { %v2584_v20 = vpop.f32.mrb[26].mxu1 }
 0x1a4   : > { %v2590_v21 = vadd.f32 %v2584_v20, %v2421_v19  ;;  %v4887_v22 = vpop.f32.mrb[27].mxu1 }
 0x1ac   : > { %v2753_v23 = vpop.f32.mrb[28].mxu1 }
 0x1ad   : > { %v2759_v24 = vadd.f32 %v2753_v23, %v2590_v21  ;;  %v4892_v25 = vpop.f32.mrb[29].mxu1 }
 0x1b0   : > { %v2922_v26 = vpop.f32.mrb[30].mxu1 }
 0x1b1   : > { %v2928_v27 = vadd.f32 %v2922_v26, %v2759_v24  ;;  %v4897_v28 = vpop.f32.mrb[31].mxu1 }
 0x1b7   : > { %v3091_v29 = vpop.f32.mrb[32].mxu1 }
 0x1b8   : > { %v3097_v30 = vadd.f32 %v3091_v29, %v2928_v27  ;;  %v4902_v31 = vpop.f32.mrb[33].mxu1 }
 0x1bb   : > { %v3260_v32 = vpop.f32.mrb[34].mxu1 }
 0x1bc   : > { %v3266_v33 = vadd.f32 %v3260_v32, %v3097_v30  ;;  %v4907_v34 = vpop.f32.mrb[35].mxu1 }
 0x1c4   : > { %v3429_v35 = vpop.f32.mrb[36].mxu1 }
 0x1c5   : > { %v3435_v36 = vadd.f32 %v3429_v35, %v3266_v33  ;;  %v4912_v37 = vpop.f32.mrb[37].mxu1 }
 0x1c8   : > { %v3598_v38 = vpop.f32.mrb[38].mxu1 }
 0x1c9   : > { %v3604_v39 = vadd.f32 %v3598_v38, %v3435_v36  ;;  %v4917_v40 = vpop.f32.mrb[39].mxu1 }
 0x1d7   : > { %v3771_v41 = vpop.f32.mrb[40].mxu1 }
 0x1d8   : > { %v3777_v42 = vadd.f32 %v3771_v41, %v3604_v39  ;;  %v4922_v43 = vpop.f32.mrb[41].mxu1 }
 0x1df   : > { %v3944_v44 = vpop.f32.mrb[42].mxu1 }
 0x1e0   : > { %v3950_v45 = vadd.f32 %v3944_v44, %v3777_v42  ;;  %v4927_v46 = vpop.f32.mrb[43].mxu1 }
 0x1e4   : > { %v4117_v47 = vpop.f32.mrb[44].mxu1 }
 0x1e5   : > { %v4123_v48 = vadd.f32 %v4117_v47, %v3950_v45  ;;  %v4932_v49 = vpop.f32.mrb[45].mxu1 }
 0x1ec   : > { %v4290_v50 = vpop.f32.mrb[46].mxu1 }
 0x1ed   : > { %v4296_v51 = vadd.f32 %v4290_v50, %v4123_v48  ;;  %v4937_v52 = vpop.f32.mrb[47].mxu1 }
 0x1f0   : > { %v4463_v53 = vpop.f32.mrb[48].mxu1 }
 0x1f1   : > { %v4469_v55 = vadd.f32 %v4463_v53, %v4296_v51  ;;  %v4942_v56 = vpop.f32.mrb[49].mxu1 }
 0x1f3   : > { %v4478_v57 = vadd.f32 %v4474_v54, %v4469_v55 }
 0x1f5   : > { %4482 = vst.msk [vmem:[%s243_s4 + $0x10] sm:$0x1f] %vm4481_vm0, %v4478_v57 }
 0x221   : > { %v4392_v58 = vpop.f32.mrb[0].mxu0 }
 0x222   : > { %v4476_v59 = vadd.f32 %v4474_v54, %v4392_v58  ;;  %v4394_v60 = vpop.f32.mrb[1].mxu0 }
 0x223   : > { %v4477_v61 = vadd.f32 %v4474_v54, %v4394_v60 }
 0x224   : > { %4479 = vst [vmem:[%s243_s4] sm:$0x1f] %v4476_v59 }
 0x225   : > { %4480 = vst [vmem:[%s243_s4 + $0x8] sm:$0x1f] %v4477_v61 }
 0x226 PF: > { %s13_s14 = sadd.s32 1, %s5096_s14   ;;  %s5787_s12 = smov %s5092_s13 }
 0x227   : > { %p10_p5 = scmp.ge.s32.totalorder %s13_s14, 4   ;;  %s5788_s13 = smov %s5790_s15 }
 0x229   :  { %12 = sbr.rel (!%p10_p5) target bundleno = 2 (0x2), region = 92 }

</bundles_post_ra>
